<compile_context>
chip_gen: v7x
topology: tpu7x:2x2x1
jax: 0.10.0
libtpu: 0.0.40
codegen_flags: <defaults>
</compile_context>

<pallas_src>
import jax
import jax.numpy as jnp
from jax.experimental import pallas as pl
from jax.experimental.pallas import tpu as pltpu

# --- configuration (WN(n_in_channels, n_mel_channels, n_layers, n_channels, kernel_size)) ---
N_IN = 4          # n_in_channels
N_MEL = 8         # n_mel_channels
N_LAYERS = 3      # n_layers
N_CHANNELS = 32   # n_channels (must be even)
KSIZE = 3         # kernel_size (must be odd)
B = 2             # batch
T = 16            # sequence length


# ----------------------------------------------------------------------------------
# Pallas kernel: full WN forward for one batch-block (rows = batch_per_block * T).
# ----------------------------------------------------------------------------------
def make_wn_kernel(n_layers, n_channels, n_in, n_mel, ksize, t, rows):
    nc = n_channels
    assert 2 * nc <= 128, (
        "merged filter/gate path assumes 2*n_channels fits one 128-lane vreg; "
        "use the weight-level f/g split for production sizes")

    def kernel(inp_ref,
               w_start_ref, b_start_ref,
               w_in_ref, b_in_ref,
               w_rr_ref, b_rr_ref,
               w_rs_ref, b_rs_ref,
               w_end_ref, b_end_ref,
               out_ref):
        f32 = jnp.float32
        inp = inp_ref[...].astype(f32)            # (rows, n_in + n_mel)
        x = inp[:, :n_in]                         # (rows, n_in)
        sp = inp[:, n_in:]                        # (rows, n_mel)

        # time-within-sequence index of each flattened row (sublane axis)
        tt = jax.lax.broadcasted_iota(jnp.int32, (rows, 1), 0) % t

        # Hoisted per-shift validity masks (0/1 f32 multiplicands, built ONCE before
        # the layer loop -- don't re-materialize the broadcast per (layer, tap)).
        shift_mask = {}
        for i in range(n_layers):
            d = 2 ** i
            for k in range(ksize):
                s = (k - ksize // 2) * d
                if s != 0 and s not in shift_mask:
                    valid = jnp.logical_and(tt + s >= 0, tt + s < t)       # (rows, 1)
                    shift_mask[s] = jnp.broadcast_to(valid, (rows, nc)).astype(f32)

        # start 1x1 conv: (rows, n_in) @ (n_in, nc)
        audio = jnp.dot(x, w_start_ref[...], preferred_element_type=f32) + b_start_ref[...]

        output = None
        for i in range(n_layers):
            dilation = 2 ** i

            # im2col of the K dilated taps (XLU roll + hoisted mask) plus the cond
            # input, lane-concatenated once.  The cond 1x1 conv is fused into the same
            # matmul by stacking w_cond under w_in on the contraction axis.
            taps = []
            for k in range(ksize):
                s = (k - ksize // 2) * dilation
                if s == 0:
                    taps.append(audio)
                else:
                    rolled = pltpu.roll(audio, (-s) % rows, axis=0)
                    taps.append(rolled * shift_mask[s])
            taps.append(sp)
            xs_cat = jnp.concatenate(taps, axis=1)            # (rows, K*nc + n_mel)

            # single fused (dilated conv + cond) matmul; biases pre-folded wrapper-side
            in_act = jnp.dot(xs_cat, w_in_ref[i], preferred_element_type=f32) + b_in_ref[i]

            # fused_add_tanh_sigmoid_multiply: filter/gate split is a static intra-vreg
            # lane slice (2*nc = 64 <= 128 lanes); tanh/sigmoid go to the EUP.
            acts = jnp.tanh(in_act[:, :nc]) * jax.nn.sigmoid(in_act[:, nc:])

            # skip (output) half -- present on every layer
            skip = jnp.dot(acts, w_rs_ref[i], preferred_element_type=f32) + b_rs_ref[i]
            output = skip if output is None else output + skip
            # TODO(synk): on v7x at production sizes, accumulate skip in the MRB via
            # explicit matmul_acc/pop instead of VPU adds.

            # residual half -- last layer has none (dead add dropped, weight not shipped)
            if i < n_layers - 1:
                audio = audio + jnp.dot(acts, w_rr_ref[i],
                                        preferred_element_type=f32) + b_rr_ref[i]

        # end 1x1 conv, single writeback
        # TODO(synk): for production long-T, relayout the output lane-dense
        # (last dim a multiple of 128) before the store to avoid masked vst.msk.
        out = jnp.dot(output, w_end_ref[...], preferred_element_type=f32) + b_end_ref[...]
        out_ref[...] = out.astype(out_ref.dtype)

    return kernel


def wn_forward_pallas(audio_btc, spect_btc, kparams, *, num_blocks=None):
    (w_start, b_start, w_in, b_in,
     w_rr, b_rr, w_rs, b_rs, w_end, b_end) = kparams

    b, t, n_in = audio_btc.shape
    n_mel = spect_btc.shape[-1]
    n_layers = w_in.shape[0]
    n_channels = w_rs.shape[-1]

    # Megacore split: only when each block carries substantial matmul rows (otherwise
    # both cores re-DMA the full weight stack and pay per-step overhead for nothing).
    # TODO(synk): for production long-T, split on a T-tile grid axis (with halo rows)
    # so weights stay resident per core, rather than on the batch axis.
    if num_blocks is None:
        num_blocks = 2 if (b % 2 == 0 and (b * t) // 2 >= 1024) else 1
    assert b % num_blocks == 0
    rows = (b // num_blocks) * t        # rows per grid step (flattened batch*time)

    # single lane-concatenated activation input: one DMA instead of two narrow ones
    inp_flat = jnp.concatenate(
        [audio_btc.reshape(b * t, n_in), spect_btc.reshape(b * t, n_mel)], axis=1)

    def wspec(arr):
        nd = arr.ndim
        return pl.BlockSpec(arr.shape, lambda i, _nd=nd: (0,) * _nd)

    ksize = (w_in.shape[1] - n_mel) // n_channels
    kernel = make_wn_kernel(n_layers, n_channels, n_in, n_mel, ksize, t, rows)

    out_flat = pl.pallas_call(
        kernel,
        out_shape=jax.ShapeDtypeStruct((b * t, 2 * n_in), audio_btc.dtype),
        grid=(num_blocks,),
        in_specs=[
            pl.BlockSpec((rows, n_in + n_mel), lambda i: (i, 0)),
            wspec(w_start), wspec(b_start),
            wspec(w_in), wspec(b_in),
            wspec(w_rr), wspec(b_rr),
            wspec(w_rs), wspec(b_rs),
            wspec(w_end), wspec(b_end),
        ],
        out_specs=pl.BlockSpec((rows, 2 * n_in), lambda i: (i, 0)),
        compiler_params=pltpu.CompilerParams(dimension_semantics=("parallel",)),
    )(inp_flat, w_start, b_start, w_in, b_in,
      w_rr, b_rr, w_rs, b_rs, w_end, b_end)

    return out_flat.reshape(b, t, 2 * n_in)


# ----------------------------------------------------------------------------------
# Deterministic parameter init (PyTorch Conv1d layout: (Cout, Cin, K)), weight-norm fold.
# ----------------------------------------------------------------------------------
def init_torch_params(key, n_in, n_mel, n_layers, n_channels, ksize):
    keys = iter(jax.random.split(key, 64))

    def wnorm_conv(cout, cin, ks):
        v = 0.1 * jax.random.normal(next(keys), (cout, cin, ks), jnp.float32)
        g = 1.0 + 0.1 * jax.random.normal(next(keys), (cout,), jnp.float32)
        norm = jnp.sqrt(jnp.sum(v * v, axis=(1, 2)))
        return g[:, None, None] * v / norm[:, None, None]

    def bias(cout):
        return 0.1 * jax.random.normal(next(keys), (cout,), jnp.float32)

    sw, sb = wnorm_conv(n_channels, n_in, 1), bias(n_channels)
    cw, cb = wnorm_conv(2 * n_channels * n_layers, n_mel, 1), bias(2 * n_channels * n_layers)
    in_ws, in_bs, rs_ws, rs_bs = [], [], [], []
    for i in range(n_layers):
        in_ws.append(wnorm_conv(2 * n_channels, n_channels, ksize))
        in_bs.append(bias(2 * n_channels))
        res_ch = 2 * n_channels if i < n_layers - 1 else n_channels
        rs_ws.append(wnorm_conv(res_ch, n_channels, 1))
        rs_bs.append(bias(res_ch))
    # PyTorch zero-inits `end`; we use nonzero values so the check is nontrivial.
    ew, eb = wnorm_conv(2 * n_in, n_channels, 1), bias(2 * n_in)
    return (sw, sb, cw, cb, in_ws, in_bs, rs_ws, rs_bs, ew, eb)


def torch_to_kernel_params(tp, n_layers, n_channels, ksize):
    """Repack torch-layout effective weights into the fused, lane-aligned kernel layout."""
    (sw, sb, cw, cb, in_ws, in_bs, rs_ws, rs_bs, ew, eb) = tp
    nc = n_channels

    w_start = sw[:, :, 0].T                       # (n_in, nc)
    b_start = sb[None, :]                         # (1, nc)

    w_in, b_in = [], []
    w_rr, b_rr, w_rs, b_rs = [], [], [], []
    for i in range(n_layers):
        off = i * 2 * nc
        # dilated conv: im2col layout (K*nc, 2*nc)
        wi = jnp.transpose(in_ws[i], (2, 1, 0)).reshape(ksize * nc, 2 * nc)
        # per-layer cond chunk stacked UNDER the in-layer weight on the contraction axis
        wc = cw[off:off + 2 * nc, :, 0].T                      # (n_mel, 2*nc)
        w_in.append(jnp.concatenate([wi, wc], axis=0))         # (K*nc + n_mel, 2*nc)
        # pre-fold in-layer bias with the matching cond-layer bias chunk
        b_in.append((in_bs[i] + cb[off:off + 2 * nc])[None, :])

        # res/skip split at the weight level; last layer is skip-only (no dead weight)
        rw = rs_ws[i][:, :, 0]                    # (res_ch, nc)
        rb = rs_bs[i]
        if i < n_layers - 1:
            w_rr.append(rw[:nc, :].T)
            b_rr.append(rb[:nc][None, :])
            w_rs.append(rw[nc:, :].T)
            b_rs.append(rb[nc:][None, :])
        else:
            w_rs.append(rw.T)
            b_rs.append(rb[None, :])

    if not w_rr:  # n_layers == 1: ship a single unused slab so stacking is well-formed
        w_rr.append(jnp.zeros((nc, nc), jnp.float32))
        b_rr.append(jnp.zeros((1, nc), jnp.float32))

    w_end = ew[:, :, 0].T                         # (nc, 2*n_in)
    b_end = eb[None, :]                           # (1, 2*n_in)

    return (w_start, b_start,
            jnp.stack(w_in), jnp.stack(b_in),
            jnp.stack(w_rr), jnp.stack(b_rr),
            jnp.stack(w_rs), jnp.stack(b_rs),
            w_end, b_end)


# ----------------------------------------------------------------------------------
# Pure-JAX reference (mirrors the PyTorch forward, NCL layout, lax conv).
# ----------------------------------------------------------------------------------
def wn_forward_ref(audio_ncl, spect_ncl, tp, n_channels, n_layers):
    (sw, sb, cw, cb, in_ws, in_bs, rs_ws, rs_bs, ew, eb) = tp

    def conv1d(x, w, b, dilation=1):
        k = w.shape[-1]
        pad = (k * dilation - dilation) // 2
        y = jax.lax.conv_general_dilated(
            x, w, window_strides=(1,), padding=[(pad, pad)],
            rhs_dilation=(dilation,), dimension_numbers=("NCH", "OIH", "NCH"))
        return y + b[None, :, None]

    audio = conv1d(audio_ncl, sw, sb)
    spect = conv1d(spect_ncl, cw, cb)
    output = jnp.zeros_like(audio)
    for i in range(n_layers):
        off = i * 2 * n_channels
        in_act = conv1d(audio, in_ws[i], in_bs[i], dilation=2 ** i) \
            + spect[:, off:off + 2 * n_channels, :]
        acts = jnp.tanh(in_act[:, :n_channels, :]) * jax.nn.sigmoid(in_act[:, n_channels:, :])
        rs = conv1d(acts, rs_ws[i], rs_bs[i])
        if i < n_layers - 1:
            audio = audio + rs[:, :n_channels, :]
            output = output + rs[:, n_channels:, :]
        else:
            output = output + rs
    return conv1d(output, ew, eb)


if __name__ == "__main__":
    key = jax.random.PRNGKey(0)
    k_audio, k_spect, k_params = jax.random.split(key, 3)

    # PyTorch-convention inputs (NCL)
    audio_ncl = jax.random.normal(k_audio, (B, N_IN, T), jnp.float32)
    spect_ncl = jax.random.normal(k_spect, (B, N_MEL, T), jnp.float32)

    tparams = init_torch_params(k_params, N_IN, N_MEL, N_LAYERS, N_CHANNELS, KSIZE)
    kparams = torch_to_kernel_params(tparams, N_LAYERS, N_CHANNELS, KSIZE)

    # kernel layout (B, T, C)
    audio_btc = jnp.transpose(audio_ncl, (0, 2, 1))
    spect_btc = jnp.transpose(spect_ncl, (0, 2, 1))

    out_btc = wn_forward_pallas(audio_btc, spect_btc, kparams)
    out_btc = jax.block_until_ready(out_btc)
    out_ncl = jnp.transpose(out_btc, (0, 2, 1))      # back to (B, 2*N_IN, T)

    ref_ncl = wn_forward_ref(audio_ncl, spect_ncl, tparams, N_CHANNELS, N_LAYERS)
    ref_ncl = jax.block_until_ready(ref_ncl)

    if not jnp.allclose(out_ncl, ref_ncl, rtol=2e-4, atol=2e-5):
        raise AssertionError(
            f"mismatch: max abs err = {float(jnp.max(jnp.abs(out_ncl - ref_ncl)))}")
    print("KERNEL_OK")
</pallas_src>

<mosaic_0001>
module attributes {stable_mosaic.version = 11 : i64} {
  func.func @kernel(%arg0: i32, %arg1: memref<32x12xf32, #tpu.memory_space<vmem>>, %arg2: memref<4x32xf32, #tpu.memory_space<vmem>>, %arg3: memref<1x32xf32, #tpu.memory_space<vmem>>, %arg4: memref<3x104x64xf32, #tpu.memory_space<vmem>>, %arg5: memref<3x1x64xf32, #tpu.memory_space<vmem>>, %arg6: memref<2x32x32xf32, #tpu.memory_space<vmem>>, %arg7: memref<2x1x32xf32, #tpu.memory_space<vmem>>, %arg8: memref<3x32x32xf32, #tpu.memory_space<vmem>>, %arg9: memref<3x1x32xf32, #tpu.memory_space<vmem>>, %arg10: memref<32x8xf32, #tpu.memory_space<vmem>>, %arg11: memref<1x8xf32, #tpu.memory_space<vmem>>, %arg12: memref<32x8xf32, #tpu.memory_space<vmem>>) attributes {dimension_semantics = [#tpu.dimension_semantics<parallel>], iteration_bounds = array<i64: 1>, scalar_prefetch = 0 : i64, scratch_operands = 0 : i64, tpu.core_type = #tpu.core_type<tc>, window_params = [{transform_indices = @transform_0, window_bounds = array<i64: 32, 12>}, {pipeline_mode = #tpu.pipeline_mode<synchronous>, transform_indices = @transform_1, window_bounds = array<i64: 4, 32>}, {pipeline_mode = #tpu.pipeline_mode<synchronous>, transform_indices = @transform_2, window_bounds = array<i64: 1, 32>}, {pipeline_mode = #tpu.pipeline_mode<synchronous>, transform_indices = @transform_3, window_bounds = array<i64: 3, 104, 64>}, {pipeline_mode = #tpu.pipeline_mode<synchronous>, transform_indices = @transform_4, window_bounds = array<i64: 3, 1, 64>}, {pipeline_mode = #tpu.pipeline_mode<synchronous>, transform_indices = @transform_5, window_bounds = array<i64: 2, 32, 32>}, {pipeline_mode = #tpu.pipeline_mode<synchronous>, transform_indices = @transform_6, window_bounds = array<i64: 2, 1, 32>}, {pipeline_mode = #tpu.pipeline_mode<synchronous>, transform_indices = @transform_7, window_bounds = array<i64: 3, 32, 32>}, {pipeline_mode = #tpu.pipeline_mode<synchronous>, transform_indices = @transform_8, window_bounds = array<i64: 3, 1, 32>}, {pipeline_mode = #tpu.pipeline_mode<synchronous>, transform_indices = @transform_9, window_bounds = array<i64: 32, 8>}, {pipeline_mode = #tpu.pipeline_mode<synchronous>, transform_indices = @transform_10, window_bounds = array<i64: 1, 8>}, {transform_indices = @transform_11, window_bounds = array<i64: 32, 8>}]} {
    %c0 = arith.constant 0 : index
    %c0_0 = arith.constant 0 : index
    %0 = vector.load %arg1[%c0, %c0_0] : memref<32x12xf32, #tpu.memory_space<vmem>>, vector<32x12xf32>
    %1 = vector.extract_strided_slice %0 {offsets = [0, 0], sizes = [32, 4], strides = [1, 1]} : vector<32x12xf32> to vector<32x4xf32>
    %2 = vector.extract_strided_slice %0 {offsets = [0, 4], sizes = [32, 8], strides = [1, 1]} : vector<32x12xf32> to vector<32x8xf32>
    %3 = tpu.iota {dimensions = array<i32: 0>} : vector<32x1xi32>
    %c16_i32 = arith.constant 16 : i32
    %c0_i32 = arith.constant 0 : i32
    %4 = arith.cmpi eq, %c16_i32, %c0_i32 : i32
    %c1_i32 = arith.constant 1 : i32
    %5 = arith.select %4, %c1_i32, %c16_i32 : i32
    %6 = vector.broadcast %5 : i32 to vector<32x1xi32>
    %7 = arith.remsi %3, %6 : vector<32x1xi32>
    %c0_i32_1 = arith.constant 0 : i32
    %8 = vector.broadcast %c0_i32_1 : i32 to vector<32x1xi32>
    %9 = arith.cmpi ne, %7, %8 : vector<32x1xi32>
    %c0_i32_2 = arith.constant 0 : i32
    %10 = vector.broadcast %c0_i32_2 : i32 to vector<32x1xi32>
    %11 = arith.cmpi slt, %7, %10 : vector<32x1xi32>
    %c0_i32_3 = arith.constant 0 : i32
    %12 = arith.cmpi slt, %5, %c0_i32_3 : i32
    %13 = vector.broadcast %12 : i1 to vector<32x1xi1>
    %14 = vector.broadcast %13 : vector<32x1xi1> to vector<32x1xi1>
    %15 = arith.xori %11, %14 : vector<32x1xi1>
    %16 = arith.andi %15, %9 : vector<32x1xi1>
    %17 = vector.broadcast %5 : i32 to vector<32x1xi32>
    %18 = arith.addi %7, %17 : vector<32x1xi32>
    %19 = arith.select %16, %18, %7 : vector<32x1xi1>, vector<32x1xi32>
    %c-1_i32 = arith.constant -1 : i32
    %20 = vector.broadcast %c-1_i32 : i32 to vector<32x1xi32>
    %21 = arith.addi %19, %20 : vector<32x1xi32>
    %c0_i32_4 = arith.constant 0 : i32
    %22 = vector.broadcast %c0_i32_4 : i32 to vector<32x1xi32>
    %23 = arith.cmpi sge, %21, %22 : vector<32x1xi32>
    %c-1_i32_5 = arith.constant -1 : i32
    %24 = vector.broadcast %c-1_i32_5 : i32 to vector<32x1xi32>
    %25 = arith.addi %19, %24 : vector<32x1xi32>
    %c16_i32_6 = arith.constant 16 : i32
    %26 = vector.broadcast %c16_i32_6 : i32 to vector<32x1xi32>
    %27 = arith.cmpi slt, %25, %26 : vector<32x1xi32>
    %28 = arith.andi %23, %27 : vector<32x1xi1>
    %29 = vector.shape_cast %28 : vector<32x1xi1> to vector<32x1xi1>
    %30 = vector.broadcast %29 : vector<32x1xi1> to vector<32x32xi1>
    %31 = arith.extui %30 : vector<32x32xi1> to vector<32x32xi32>
    %32 = arith.sitofp %31 : vector<32x32xi32> to vector<32x32xf32>
    %c1_i32_7 = arith.constant 1 : i32
    %33 = vector.broadcast %c1_i32_7 : i32 to vector<32x1xi32>
    %34 = arith.addi %19, %33 : vector<32x1xi32>
    %c0_i32_8 = arith.constant 0 : i32
    %35 = vector.broadcast %c0_i32_8 : i32 to vector<32x1xi32>
    %36 = arith.cmpi sge, %34, %35 : vector<32x1xi32>
    %c1_i32_9 = arith.constant 1 : i32
    %37 = vector.broadcast %c1_i32_9 : i32 to vector<32x1xi32>
    %38 = arith.addi %19, %37 : vector<32x1xi32>
    %c16_i32_10 = arith.constant 16 : i32
    %39 = vector.broadcast %c16_i32_10 : i32 to vector<32x1xi32>
    %40 = arith.cmpi slt, %38, %39 : vector<32x1xi32>
    %41 = arith.andi %36, %40 : vector<32x1xi1>
    %42 = vector.shape_cast %41 : vector<32x1xi1> to vector<32x1xi1>
    %43 = vector.broadcast %42 : vector<32x1xi1> to vector<32x32xi1>
    %44 = arith.extui %43 : vector<32x32xi1> to vector<32x32xi32>
    %45 = arith.sitofp %44 : vector<32x32xi32> to vector<32x32xf32>
    %c-2_i32 = arith.constant -2 : i32
    %46 = vector.broadcast %c-2_i32 : i32 to vector<32x1xi32>
    %47 = arith.addi %19, %46 : vector<32x1xi32>
    %c0_i32_11 = arith.constant 0 : i32
    %48 = vector.broadcast %c0_i32_11 : i32 to vector<32x1xi32>
    %49 = arith.cmpi sge, %47, %48 : vector<32x1xi32>
    %c-2_i32_12 = arith.constant -2 : i32
    %50 = vector.broadcast %c-2_i32_12 : i32 to vector<32x1xi32>
    %51 = arith.addi %19, %50 : vector<32x1xi32>
    %c16_i32_13 = arith.constant 16 : i32
    %52 = vector.broadcast %c16_i32_13 : i32 to vector<32x1xi32>
    %53 = arith.cmpi slt, %51, %52 : vector<32x1xi32>
    %54 = arith.andi %49, %53 : vector<32x1xi1>
    %55 = vector.shape_cast %54 : vector<32x1xi1> to vector<32x1xi1>
    %56 = vector.broadcast %55 : vector<32x1xi1> to vector<32x32xi1>
    %57 = arith.extui %56 : vector<32x32xi1> to vector<32x32xi32>
    %58 = arith.sitofp %57 : vector<32x32xi32> to vector<32x32xf32>
    %c2_i32 = arith.constant 2 : i32
    %59 = vector.broadcast %c2_i32 : i32 to vector<32x1xi32>
    %60 = arith.addi %19, %59 : vector<32x1xi32>
    %c0_i32_14 = arith.constant 0 : i32
    %61 = vector.broadcast %c0_i32_14 : i32 to vector<32x1xi32>
    %62 = arith.cmpi sge, %60, %61 : vector<32x1xi32>
    %c2_i32_15 = arith.constant 2 : i32
    %63 = vector.broadcast %c2_i32_15 : i32 to vector<32x1xi32>
    %64 = arith.addi %19, %63 : vector<32x1xi32>
    %c16_i32_16 = arith.constant 16 : i32
    %65 = vector.broadcast %c16_i32_16 : i32 to vector<32x1xi32>
    %66 = arith.cmpi slt, %64, %65 : vector<32x1xi32>
    %67 = arith.andi %62, %66 : vector<32x1xi1>
    %68 = vector.shape_cast %67 : vector<32x1xi1> to vector<32x1xi1>
    %69 = vector.broadcast %68 : vector<32x1xi1> to vector<32x32xi1>
    %70 = arith.extui %69 : vector<32x32xi1> to vector<32x32xi32>
    %71 = arith.sitofp %70 : vector<32x32xi32> to vector<32x32xf32>
    %c-4_i32 = arith.constant -4 : i32
    %72 = vector.broadcast %c-4_i32 : i32 to vector<32x1xi32>
    %73 = arith.addi %19, %72 : vector<32x1xi32>
    %c0_i32_17 = arith.constant 0 : i32
    %74 = vector.broadcast %c0_i32_17 : i32 to vector<32x1xi32>
    %75 = arith.cmpi sge, %73, %74 : vector<32x1xi32>
    %c-4_i32_18 = arith.constant -4 : i32
    %76 = vector.broadcast %c-4_i32_18 : i32 to vector<32x1xi32>
    %77 = arith.addi %19, %76 : vector<32x1xi32>
    %c16_i32_19 = arith.constant 16 : i32
    %78 = vector.broadcast %c16_i32_19 : i32 to vector<32x1xi32>
    %79 = arith.cmpi slt, %77, %78 : vector<32x1xi32>
    %80 = arith.andi %75, %79 : vector<32x1xi1>
    %81 = vector.shape_cast %80 : vector<32x1xi1> to vector<32x1xi1>
    %82 = vector.broadcast %81 : vector<32x1xi1> to vector<32x32xi1>
    %83 = arith.extui %82 : vector<32x32xi1> to vector<32x32xi32>
    %84 = arith.sitofp %83 : vector<32x32xi32> to vector<32x32xf32>
    %c4_i32 = arith.constant 4 : i32
    %85 = vector.broadcast %c4_i32 : i32 to vector<32x1xi32>
    %86 = arith.addi %19, %85 : vector<32x1xi32>
    %c0_i32_20 = arith.constant 0 : i32
    %87 = vector.broadcast %c0_i32_20 : i32 to vector<32x1xi32>
    %88 = arith.cmpi sge, %86, %87 : vector<32x1xi32>
    %c4_i32_21 = arith.constant 4 : i32
    %89 = vector.broadcast %c4_i32_21 : i32 to vector<32x1xi32>
    %90 = arith.addi %19, %89 : vector<32x1xi32>
    %c16_i32_22 = arith.constant 16 : i32
    %91 = vector.broadcast %c16_i32_22 : i32 to vector<32x1xi32>
    %92 = arith.cmpi slt, %90, %91 : vector<32x1xi32>
    %93 = arith.andi %88, %92 : vector<32x1xi1>
    %94 = vector.shape_cast %93 : vector<32x1xi1> to vector<32x1xi1>
    %95 = vector.broadcast %94 : vector<32x1xi1> to vector<32x32xi1>
    %96 = arith.extui %95 : vector<32x32xi1> to vector<32x32xi32>
    %97 = arith.sitofp %96 : vector<32x32xi32> to vector<32x32xf32>
    %c0_23 = arith.constant 0 : index
    %c0_24 = arith.constant 0 : index
    %98 = vector.load %arg2[%c0_23, %c0_24] : memref<4x32xf32, #tpu.memory_space<vmem>>, vector<4x32xf32>
    %cst = arith.constant dense<0.000000e+00> : vector<32x32xf32>
    %99 = tpu.matmul %1, %98, %cst {dimension_numbers = #tpu.dot_dimension_numbers<[1], [0], [0], [1], [0, 0, 1, 1], [], []>} : vector<32x4xf32>, vector<4x32xf32>, vector<32x32xf32> -> vector<32x32xf32>
    %c0_25 = arith.constant 0 : index
    %c0_26 = arith.constant 0 : index
    %100 = vector.load %arg3[%c0_25, %c0_26] : memref<1x32xf32, #tpu.memory_space<vmem>>, vector<1x32xf32>
    %101 = vector.broadcast %100 : vector<1x32xf32> to vector<32x32xf32>
    %102 = arith.addf %99, %101 : vector<32x32xf32>
    %c1_i32_27 = arith.constant 1 : i32
    %103 = tpu.dynamic_rotate %102 by %c1_i32_27 dim 0 : vector<32x32xf32>, i32 -> vector<32x32xf32>
    %104 = arith.mulf %103, %32 : vector<32x32xf32>
    %c31_i32 = arith.constant 31 : i32
    %105 = tpu.dynamic_rotate %102 by %c31_i32 dim 0 : vector<32x32xf32>, i32 -> vector<32x32xf32>
    %106 = arith.mulf %105, %45 : vector<32x32xf32>
    %107 = tpu.concatenate %104, %102, %106, %2 in 1 : vector<32x32xf32>, vector<32x32xf32>, vector<32x32xf32>, vector<32x8xf32> -> vector<32x104xf32>
    %c0_28 = arith.constant 0 : index
    %c0_29 = arith.constant 0 : index
    %c0_30 = arith.constant 0 : index
    %108 = vector.load %arg4[%c0_28, %c0_29, %c0_30] : memref<3x104x64xf32, #tpu.memory_space<vmem>>, vector<1x104x64xf32>
    %109 = vector.shape_cast %108 : vector<1x104x64xf32> to vector<104x64xf32>
    %cst_31 = arith.constant dense<0.000000e+00> : vector<32x64xf32>
    %110 = tpu.matmul %107, %109, %cst_31 {dimension_numbers = #tpu.dot_dimension_numbers<[1], [0], [0], [1], [0, 0, 1, 1], [], []>} : vector<32x104xf32>, vector<104x64xf32>, vector<32x64xf32> -> vector<32x64xf32>
    %c0_32 = arith.constant 0 : index
    %c0_33 = arith.constant 0 : index
    %c0_34 = arith.constant 0 : index
    %111 = vector.load %arg5[%c0_32, %c0_33, %c0_34] : memref<3x1x64xf32, #tpu.memory_space<vmem>>, vector<1x1x64xf32>
    %112 = vector.shape_cast %111 : vector<1x1x64xf32> to vector<1x64xf32>
    %113 = vector.broadcast %112 : vector<1x64xf32> to vector<32x64xf32>
    %114 = arith.addf %110, %113 : vector<32x64xf32>
    %115 = vector.extract_strided_slice %114 {offsets = [0, 0], sizes = [32, 32], strides = [1, 1]} : vector<32x64xf32> to vector<32x32xf32>
    %116 = math.tanh %115 : vector<32x32xf32>
    %117 = vector.extract_strided_slice %114 {offsets = [0, 32], sizes = [32, 32], strides = [1, 1]} : vector<32x64xf32> to vector<32x32xf32>
    %118 = arith.negf %117 : vector<32x32xf32>
    %119 = math.exp %118 : vector<32x32xf32>
    %cst_35 = arith.constant 1.000000e+00 : f32
    %120 = vector.broadcast %cst_35 : f32 to vector<32x32xf32>
    %121 = arith.addf %120, %119 : vector<32x32xf32>
    %122 = arith.divf %120, %121 : vector<32x32xf32>
    %123 = arith.mulf %116, %122 : vector<32x32xf32>
    %c0_36 = arith.constant 0 : index
    %c0_37 = arith.constant 0 : index
    %c0_38 = arith.constant 0 : index
    %124 = vector.load %arg8[%c0_36, %c0_37, %c0_38] : memref<3x32x32xf32, #tpu.memory_space<vmem>>, vector<1x32x32xf32>
    %125 = vector.shape_cast %124 : vector<1x32x32xf32> to vector<32x32xf32>
    %cst_39 = arith.constant dense<0.000000e+00> : vector<32x32xf32>
    %126 = tpu.matmul %123, %125, %cst_39 {dimension_numbers = #tpu.dot_dimension_numbers<[1], [0], [0], [1], [0, 0, 1, 1], [], []>} : vector<32x32xf32>, vector<32x32xf32>, vector<32x32xf32> -> vector<32x32xf32>
    %c0_40 = arith.constant 0 : index
    %c0_41 = arith.constant 0 : index
    %c0_42 = arith.constant 0 : index
    %127 = vector.load %arg9[%c0_40, %c0_41, %c0_42] : memref<3x1x32xf32, #tpu.memory_space<vmem>>, vector<1x1x32xf32>
    %128 = vector.shape_cast %127 : vector<1x1x32xf32> to vector<1x32xf32>
    %129 = vector.broadcast %128 : vector<1x32xf32> to vector<32x32xf32>
    %130 = arith.addf %126, %129 : vector<32x32xf32>
    %c0_43 = arith.constant 0 : index
    %c0_44 = arith.constant 0 : index
    %c0_45 = arith.constant 0 : index
    %131 = vector.load %arg6[%c0_43, %c0_44, %c0_45] : memref<2x32x32xf32, #tpu.memory_space<vmem>>, vector<1x32x32xf32>
    %132 = vector.shape_cast %131 : vector<1x32x32xf32> to vector<32x32xf32>
    %cst_46 = arith.constant dense<0.000000e+00> : vector<32x32xf32>
    %133 = tpu.matmul %123, %132, %cst_46 {dimension_numbers = #tpu.dot_dimension_numbers<[1], [0], [0], [1], [0, 0, 1, 1], [], []>} : vector<32x32xf32>, vector<32x32xf32>, vector<32x32xf32> -> vector<32x32xf32>
    %134 = arith.addf %102, %133 : vector<32x32xf32>
    %c0_47 = arith.constant 0 : index
    %c0_48 = arith.constant 0 : index
    %c0_49 = arith.constant 0 : index
    %135 = vector.load %arg7[%c0_47, %c0_48, %c0_49] : memref<2x1x32xf32, #tpu.memory_space<vmem>>, vector<1x1x32xf32>
    %136 = vector.shape_cast %135 : vector<1x1x32xf32> to vector<1x32xf32>
    %137 = vector.broadcast %136 : vector<1x32xf32> to vector<32x32xf32>
    %138 = arith.addf %134, %137 : vector<32x32xf32>
    %c2_i32_50 = arith.constant 2 : i32
    %139 = tpu.dynamic_rotate %138 by %c2_i32_50 dim 0 : vector<32x32xf32>, i32 -> vector<32x32xf32>
    %140 = arith.mulf %139, %58 : vector<32x32xf32>
    %c30_i32 = arith.constant 30 : i32
    %141 = tpu.dynamic_rotate %138 by %c30_i32 dim 0 : vector<32x32xf32>, i32 -> vector<32x32xf32>
    %142 = arith.mulf %141, %71 : vector<32x32xf32>
    %143 = tpu.concatenate %140, %138, %142, %2 in 1 : vector<32x32xf32>, vector<32x32xf32>, vector<32x32xf32>, vector<32x8xf32> -> vector<32x104xf32>
    %c1 = arith.constant 1 : index
    %c0_51 = arith.constant 0 : index
    %c0_52 = arith.constant 0 : index
    %144 = vector.load %arg4[%c1, %c0_51, %c0_52] : memref<3x104x64xf32, #tpu.memory_space<vmem>>, vector<1x104x64xf32>
    %145 = vector.shape_cast %144 : vector<1x104x64xf32> to vector<104x64xf32>
    %cst_53 = arith.constant dense<0.000000e+00> : vector<32x64xf32>
    %146 = tpu.matmul %143, %145, %cst_53 {dimension_numbers = #tpu.dot_dimension_numbers<[1], [0], [0], [1], [0, 0, 1, 1], [], []>} : vector<32x104xf32>, vector<104x64xf32>, vector<32x64xf32> -> vector<32x64xf32>
    %c1_54 = arith.constant 1 : index
    %c0_55 = arith.constant 0 : index
    %c0_56 = arith.constant 0 : index
    %147 = vector.load %arg5[%c1_54, %c0_55, %c0_56] : memref<3x1x64xf32, #tpu.memory_space<vmem>>, vector<1x1x64xf32>
    %148 = vector.shape_cast %147 : vector<1x1x64xf32> to vector<1x64xf32>
    %149 = vector.broadcast %148 : vector<1x64xf32> to vector<32x64xf32>
    %150 = arith.addf %146, %149 : vector<32x64xf32>
    %151 = vector.extract_strided_slice %150 {offsets = [0, 0], sizes = [32, 32], strides = [1, 1]} : vector<32x64xf32> to vector<32x32xf32>
    %152 = math.tanh %151 : vector<32x32xf32>
    %153 = vector.extract_strided_slice %150 {offsets = [0, 32], sizes = [32, 32], strides = [1, 1]} : vector<32x64xf32> to vector<32x32xf32>
    %154 = arith.negf %153 : vector<32x32xf32>
    %155 = math.exp %154 : vector<32x32xf32>
    %cst_57 = arith.constant 1.000000e+00 : f32
    %156 = vector.broadcast %cst_57 : f32 to vector<32x32xf32>
    %157 = arith.addf %156, %155 : vector<32x32xf32>
    %158 = arith.divf %156, %157 : vector<32x32xf32>
    %159 = arith.mulf %152, %158 : vector<32x32xf32>
    %c1_58 = arith.constant 1 : index
    %c0_59 = arith.constant 0 : index
    %c0_60 = arith.constant 0 : index
    %160 = vector.load %arg8[%c1_58, %c0_59, %c0_60] : memref<3x32x32xf32, #tpu.memory_space<vmem>>, vector<1x32x32xf32>
    %161 = vector.shape_cast %160 : vector<1x32x32xf32> to vector<32x32xf32>
    %cst_61 = arith.constant dense<0.000000e+00> : vector<32x32xf32>
    %162 = tpu.matmul %159, %161, %cst_61 {dimension_numbers = #tpu.dot_dimension_numbers<[1], [0], [0], [1], [0, 0, 1, 1], [], []>} : vector<32x32xf32>, vector<32x32xf32>, vector<32x32xf32> -> vector<32x32xf32>
    %c1_62 = arith.constant 1 : index
    %c0_63 = arith.constant 0 : index
    %c0_64 = arith.constant 0 : index
    %163 = vector.load %arg9[%c1_62, %c0_63, %c0_64] : memref<3x1x32xf32, #tpu.memory_space<vmem>>, vector<1x1x32xf32>
    %164 = vector.shape_cast %163 : vector<1x1x32xf32> to vector<1x32xf32>
    %165 = vector.broadcast %164 : vector<1x32xf32> to vector<32x32xf32>
    %166 = arith.addf %162, %165 : vector<32x32xf32>
    %167 = arith.addf %130, %166 : vector<32x32xf32>
    %c1_65 = arith.constant 1 : index
    %c0_66 = arith.constant 0 : index
    %c0_67 = arith.constant 0 : index
    %168 = vector.load %arg6[%c1_65, %c0_66, %c0_67] : memref<2x32x32xf32, #tpu.memory_space<vmem>>, vector<1x32x32xf32>
    %169 = vector.shape_cast %168 : vector<1x32x32xf32> to vector<32x32xf32>
    %cst_68 = arith.constant dense<0.000000e+00> : vector<32x32xf32>
    %170 = tpu.matmul %159, %169, %cst_68 {dimension_numbers = #tpu.dot_dimension_numbers<[1], [0], [0], [1], [0, 0, 1, 1], [], []>} : vector<32x32xf32>, vector<32x32xf32>, vector<32x32xf32> -> vector<32x32xf32>
    %171 = arith.addf %138, %170 : vector<32x32xf32>
    %c1_69 = arith.constant 1 : index
    %c0_70 = arith.constant 0 : index
    %c0_71 = arith.constant 0 : index
    %172 = vector.load %arg7[%c1_69, %c0_70, %c0_71] : memref<2x1x32xf32, #tpu.memory_space<vmem>>, vector<1x1x32xf32>
    %173 = vector.shape_cast %172 : vector<1x1x32xf32> to vector<1x32xf32>
    %174 = vector.broadcast %173 : vector<1x32xf32> to vector<32x32xf32>
    %175 = arith.addf %171, %174 : vector<32x32xf32>
    %c4_i32_72 = arith.constant 4 : i32
    %176 = tpu.dynamic_rotate %175 by %c4_i32_72 dim 0 : vector<32x32xf32>, i32 -> vector<32x32xf32>
    %177 = arith.mulf %176, %84 : vector<32x32xf32>
    %c28_i32 = arith.constant 28 : i32
    %178 = tpu.dynamic_rotate %175 by %c28_i32 dim 0 : vector<32x32xf32>, i32 -> vector<32x32xf32>
    %179 = arith.mulf %178, %97 : vector<32x32xf32>
    %180 = tpu.concatenate %177, %175, %179, %2 in 1 : vector<32x32xf32>, vector<32x32xf32>, vector<32x32xf32>, vector<32x8xf32> -> vector<32x104xf32>
    %c2 = arith.constant 2 : index
    %c0_73 = arith.constant 0 : index
    %c0_74 = arith.constant 0 : index
    %181 = vector.load %arg4[%c2, %c0_73, %c0_74] : memref<3x104x64xf32, #tpu.memory_space<vmem>>, vector<1x104x64xf32>
    %182 = vector.shape_cast %181 : vector<1x104x64xf32> to vector<104x64xf32>
    %cst_75 = arith.constant dense<0.000000e+00> : vector<32x64xf32>
    %183 = tpu.matmul %180, %182, %cst_75 {dimension_numbers = #tpu.dot_dimension_numbers<[1], [0], [0], [1], [0, 0, 1, 1], [], []>} : vector<32x104xf32>, vector<104x64xf32>, vector<32x64xf32> -> vector<32x64xf32>
    %c2_76 = arith.constant 2 : index
    %c0_77 = arith.constant 0 : index
    %c0_78 = arith.constant 0 : index
    %184 = vector.load %arg5[%c2_76, %c0_77, %c0_78] : memref<3x1x64xf32, #tpu.memory_space<vmem>>, vector<1x1x64xf32>
    %185 = vector.shape_cast %184 : vector<1x1x64xf32> to vector<1x64xf32>
    %186 = vector.broadcast %185 : vector<1x64xf32> to vector<32x64xf32>
    %187 = arith.addf %183, %186 : vector<32x64xf32>
    %188 = vector.extract_strided_slice %187 {offsets = [0, 0], sizes = [32, 32], strides = [1, 1]} : vector<32x64xf32> to vector<32x32xf32>
    %189 = math.tanh %188 : vector<32x32xf32>
    %190 = vector.extract_strided_slice %187 {offsets = [0, 32], sizes = [32, 32], strides = [1, 1]} : vector<32x64xf32> to vector<32x32xf32>
    %191 = arith.negf %190 : vector<32x32xf32>
    %192 = math.exp %191 : vector<32x32xf32>
    %cst_79 = arith.constant 1.000000e+00 : f32
    %193 = vector.broadcast %cst_79 : f32 to vector<32x32xf32>
    %194 = arith.addf %193, %192 : vector<32x32xf32>
    %195 = arith.divf %193, %194 : vector<32x32xf32>
    %196 = arith.mulf %189, %195 : vector<32x32xf32>
    %c2_80 = arith.constant 2 : index
    %c0_81 = arith.constant 0 : index
    %c0_82 = arith.constant 0 : index
    %197 = vector.load %arg8[%c2_80, %c0_81, %c0_82] : memref<3x32x32xf32, #tpu.memory_space<vmem>>, vector<1x32x32xf32>
    %198 = vector.shape_cast %197 : vector<1x32x32xf32> to vector<32x32xf32>
    %cst_83 = arith.constant dense<0.000000e+00> : vector<32x32xf32>
    %199 = tpu.matmul %196, %198, %cst_83 {dimension_numbers = #tpu.dot_dimension_numbers<[1], [0], [0], [1], [0, 0, 1, 1], [], []>} : vector<32x32xf32>, vector<32x32xf32>, vector<32x32xf32> -> vector<32x32xf32>
    %c2_84 = arith.constant 2 : index
    %c0_85 = arith.constant 0 : index
    %c0_86 = arith.constant 0 : index
    %200 = vector.load %arg9[%c2_84, %c0_85, %c0_86] : memref<3x1x32xf32, #tpu.memory_space<vmem>>, vector<1x1x32xf32>
    %201 = vector.shape_cast %200 : vector<1x1x32xf32> to vector<1x32xf32>
    %202 = vector.broadcast %201 : vector<1x32xf32> to vector<32x32xf32>
    %203 = arith.addf %199, %202 : vector<32x32xf32>
    %204 = arith.addf %167, %203 : vector<32x32xf32>
    %c0_87 = arith.constant 0 : index
    %c0_88 = arith.constant 0 : index
    %205 = vector.load %arg10[%c0_87, %c0_88] : memref<32x8xf32, #tpu.memory_space<vmem>>, vector<32x8xf32>
    %cst_89 = arith.constant dense<0.000000e+00> : vector<32x8xf32>
    %206 = tpu.matmul %204, %205, %cst_89 {dimension_numbers = #tpu.dot_dimension_numbers<[1], [0], [0], [1], [0, 0, 1, 1], [], []>} : vector<32x32xf32>, vector<32x8xf32>, vector<32x8xf32> -> vector<32x8xf32>
    %c0_90 = arith.constant 0 : index
    %c0_91 = arith.constant 0 : index
    %207 = vector.load %arg11[%c0_90, %c0_91] : memref<1x8xf32, #tpu.memory_space<vmem>>, vector<1x8xf32>
    %208 = vector.broadcast %207 : vector<1x8xf32> to vector<32x8xf32>
    %209 = arith.addf %206, %208 : vector<32x8xf32>
    %c0_92 = arith.constant 0 : index
    %c0_93 = arith.constant 0 : index
    %210 = vector.load %arg12[%c0_92, %c0_93] : memref<32x8xf32, #tpu.memory_space<vmem>>, vector<32x8xf32>
    tpu.vector_store %arg12[%c0_92, %c0_93], %209 {strides = array<i32>} : memref<32x8xf32, #tpu.memory_space<vmem>>, vector<32x8xf32>,
    return
  }
  func.func @transform_0(%arg0: i32) -> (i32, i32) {
    %c0_i32 = arith.constant 0 : i32
    %c0_i32_0 = arith.constant 0 : i32
    return %arg0, %c0_i32 : i32, i32
  }
  func.func @transform_1(%arg0: i32) -> (i32, i32) {
    %c0_i32 = arith.constant 0 : i32
    %c0_i32_0 = arith.constant 0 : i32
    %c0_i32_1 = arith.constant 0 : i32
    return %c0_i32, %c0_i32_0 : i32, i32
  }
  func.func @transform_2(%arg0: i32) -> (i32, i32) {
    %c0_i32 = arith.constant 0 : i32
    %c0_i32_0 = arith.constant 0 : i32
    %c0_i32_1 = arith.constant 0 : i32
    return %c0_i32, %c0_i32_0 : i32, i32
  }
  func.func @transform_3(%arg0: i32) -> (i32, i32, i32) {
    %c0_i32 = arith.constant 0 : i32
    %c0_i32_0 = arith.constant 0 : i32
    %c0_i32_1 = arith.constant 0 : i32
    %c0_i32_2 = arith.constant 0 : i32
    return %c0_i32, %c0_i32_0, %c0_i32_1 : i32, i32, i32
  }
  func.func @transform_4(%arg0: i32) -> (i32, i32, i32) {
    %c0_i32 = arith.constant 0 : i32
    %c0_i32_0 = arith.constant 0 : i32
    %c0_i32_1 = arith.constant 0 : i32
    %c0_i32_2 = arith.constant 0 : i32
    return %c0_i32, %c0_i32_0, %c0_i32_1 : i32, i32, i32
  }
  func.func @transform_5(%arg0: i32) -> (i32, i32, i32) {
    %c0_i32 = arith.constant 0 : i32
    %c0_i32_0 = arith.constant 0 : i32
    %c0_i32_1 = arith.constant 0 : i32
    %c0_i32_2 = arith.constant 0 : i32
    return %c0_i32, %c0_i32_0, %c0_i32_1 : i32, i32, i32
  }
  func.func @transform_6(%arg0: i32) -> (i32, i32, i32) {
    %c0_i32 = arith.constant 0 : i32
    %c0_i32_0 = arith.constant 0 : i32
    %c0_i32_1 = arith.constant 0 : i32
    %c0_i32_2 = arith.constant 0 : i32
    return %c0_i32, %c0_i32_0, %c0_i32_1 : i32, i32, i32
  }
  func.func @transform_7(%arg0: i32) -> (i32, i32, i32) {
    %c0_i32 = arith.constant 0 : i32
    %c0_i32_0 = arith.constant 0 : i32
    %c0_i32_1 = arith.constant 0 : i32
    %c0_i32_2 = arith.constant 0 : i32
    return %c0_i32, %c0_i32_0, %c0_i32_1 : i32, i32, i32
  }
  func.func @transform_8(%arg0: i32) -> (i32, i32, i32) {
    %c0_i32 = arith.constant 0 : i32
    %c0_i32_0 = arith.constant 0 : i32
    %c0_i32_1 = arith.constant 0 : i32
    %c0_i32_2 = arith.constant 0 : i32
    return %c0_i32, %c0_i32_0, %c0_i32_1 : i32, i32, i32
  }
  func.func @transform_9(%arg0: i32) -> (i32, i32) {
    %c0_i32 = arith.constant 0 : i32
    %c0_i32_0 = arith.constant 0 : i32
    %c0_i32_1 = arith.constant 0 : i32
    return %c0_i32, %c0_i32_0 : i32, i32
  }
  func.func @transform_10(%arg0: i32) -> (i32, i32) {
    %c0_i32 = arith.constant 0 : i32
    %c0_i32_0 = arith.constant 0 : i32
    %c0_i32_1 = arith.constant 0 : i32
    return %c0_i32, %c0_i32_0 : i32, i32
  }
  func.func @transform_11(%arg0: i32) -> (i32, i32) {
    %c0_i32 = arith.constant 0 : i32
    %c0_i32_0 = arith.constant 0 : i32
    return %arg0, %c0_i32 : i32, i32
  }
}

</mosaic_0001>

<bundles_post_ra>
// kernel: tpu_custom_call.1
= control target key start
LH: loop header
LB: loop body
LE: loop exit
PB: predicated region body
PF: predicated region fallthrough
CT: control target
= control target key end

     0   :  { %vm308_vm0 = vcmask 1043456   ;;  %vm295_vm1 = vcmask 31744   ;;  %s2407_s25 = smov 92   ;;  %v42_v14 = vlaneseq  ;;  %v2410_v46 = vmov 0.0   ;;  %s2411_s29 = smov 96   ;;  %s2989_s1 = inlined_call_operand.vmem [shape: f32[4,32], index: 1, kind: input, shape index: {}]   ;;  %s2990_s0 = inlined_call_operand.vmem [shape: f32[32,12], index: 0, kind: input, shape index: {}]   ;;  %s2991_s3 = inlined_call_operand.vmem [shape: f32[3,104,64], index: 3, kind: input, shape index: {}]   ;;  %s2992_s2 = inlined_call_operand.vmem [shape: f32[1,32], index: 2, kind: input, shape index: {}]   ;;  %s2993_s7 = inlined_call_operand.vmem [shape: f32[3,32,32], index: 7, kind: input, shape index: {}]   ;;  %s2994_s4 = inlined_call_operand.vmem [shape: f32[3,1,64], index: 4, kind: input, shape index: {}]   ;;  %s2995_s5 = inlined_call_operand.vmem [shape: f32[2,32,32], index: 5, kind: input, shape index: {}]   ;;  %s2996_s6 = inlined_call_operand.vmem [shape: f32[2,1,32], index: 6, kind: input, shape index: {}]   ;;  %s2997_s9 = inlined_call_operand.vmem [shape: f32[32,8], index: 9, kind: input, shape index: {}]   ;;  %s2998_s8 = inlined_call_operand.vmem [shape: f32[3,1,32], index: 8, kind: input, shape index: {}]   ;;  %s2999_s10 = inlined_call_operand.vmem [shape: f32[1,8], index: 10, kind: input, shape index: {}]   ;;  %s3000_s11 = inlined_call_operand.vmem [shape: f32[32,8], index: 11, kind: output, shape index: {}]  }
   0x1   :  { %v287_v0 = vld [vmem:[%s2989_s1] sm:$0xf]  ;;  %v39_v2 = vld [vmem:[%s2990_s0 + $0x8] sm:$0xff]  ;;  %v2484_v3 = vld [vmem:[%s2990_s0 + $0x10] sm:$0xff]  ;;  %vm472_vm7 = vcmask 523264   ;;  %vm467_vm8 = vcmask 261120  }
   0x2   :  { %v38_v1 = vld [vmem:[%s2990_s0] sm:$0xff]  ;;  %1998 = vmatprep.subr.msk.mxu0 %vm308_vm0, %v287_v0  ;;  %457 = vrot.lane.b32.xlu1 %v39_v2, %s2407_s25  ;;  %v2492_v4 = vld [vmem:[%s2990_s0 + $0x18] sm:$0xff]  ;;  %v483_v6 = vld [vmem:[%s2991_s3 + $0x8] sm:$0xff]  ;;  %v2519_v18 = vshrl.u32 %v42_v14, 7  ;;  %s2408_s0 = smov 32   ;;  %vm477_vm9 = vcmask 785408  }
   0x3   :  { %2000 = vmatprep.mubr.msk.f32.mxu0 %vm295_vm1, %v38_v1  ;;  %1999 = vmatpush3.msk.msra.mxu0 %vm308_vm0, %v287_v0  ;;  %v482_v5 = vld [vmem:[%s2991_s3] sm:$0xff]  ;;  %v484_v7 = vld [vmem:[%s2991_s3 + $0x10] sm:$0xff]  ;;  %v485_v9 = vld [vmem:[%s2991_s3 + $0x18] sm:$0xff]  ;;  %vm502_vm10 = vcmask 850944  }
   0x4   :  { %455 = vrot.lane.b32.xlu0 %v38_v1, %s2407_s25  ;;  %2001 = vmatmul.mubr.msk.f32.vlgmr.msra.gmra.mrb[0].mxu0 %vm295_vm1, %v39_v2  ;;  %v2186_v8 = vpack.c.bf16 %v483_v6, %v482_v5  ;;  %v2190_v10 = vpack.c.bf16 %v485_v9, %v484_v7  ;;  %v486_v11 = vld [vmem:[%s2991_s3 + $0x20] sm:$0xff]  ;;  %v487_v12 = vld [vmem:[%s2991_s3 + $0x28] sm:$0xff]  ;;  %v488_v15 = vld [vmem:[%s2991_s3 + $0x30] sm:$0xff]  ;;  %v44_v22 = vadd.s32 8, %v2519_v18  ;;  %v46_v28 = vadd.s32 24, %v2519_v18 }
   0x5   :  { %2003 = vmatprep.mubr.msk.f32.mxu0 %vm295_vm1, %v2484_v3  ;;  %v2194_v13 = vpack.c.bf16 %v487_v12, %v486_v11  ;;  %v489_v16 = vld [vmem:[%s2991_s3 + $0x38] sm:$0xff]  ;;  %v490_v19 = vld [vmem:[%s2991_s3 + $0x40] sm:$0xff]  ;;  %v491_v20 = vld [vmem:[%s2991_s3 + $0x48] sm:$0xff]  ;;  %vm414_vm2 = vcmp.lt.s32.totalorder %v2519_v18, 7  ;;  %v2587_v54 = vand.u32 15, %v2519_v18  ;;  %v45_v57 = vadd.s32 16, %v2519_v18 }
   0x6   :  { %2187 = vmatprep.subr.bf16.mxu1 %v2186_v8  ;;  %v2198_v17 = vpack.c.bf16 %v489_v16, %v488_v15  ;;  %v2202_v21 = vpack.c.bf16 %v491_v20, %v490_v19  ;;  %v492_v23 = vld [vmem:[%s2991_s3 + $0x50] sm:$0xff]  ;;  %v493_v24 = vld [vmem:[%s2991_s3 + $0x58] sm:$0xff]  ;;  %v1788_v26 = vld [vmem:[%s2992_s2] ss:$0 sm:$0xff]  ;;  %v2537_v27 = vand.u32 15, %v44_v22  ;;  %v2552_v36 = vand.u32 15, %v46_v28 }
   0x7   :  { %2189 = vmatpush3.bf16.msra.mxu1 %v2186_v8  ;;  %v2206_v25 = vpack.c.bf16 %v493_v24, %v492_v23  ;;  %v494_v33 = vld [vmem:[%s2991_s3 + $0x60] sm:$0xff]  ;;  %s2409_s2 = smov 64   ;;  %v95_v55 = vadd.s32 4294967295, %v2587_v54  ;;  %vm401_vm6 = vcmp.lt.s32.totalorder %v2519_v18, 1  ;;  %v2598_v61 = vand.u32 15, %v45_v57  ;;  %v650_v57 = vld [vmem:[%s2993_s7 + $0x10] sm:$0xff] }
   0x8   :  { %2004 = vmatmul.mubr.msk.f32.gmra.mrb[2].mxu0 %vm295_vm1, %v2492_v4  ;;  %2191 = vmatprep.subr.bf16.mxu1 %v2190_v10  ;;  %v128_v35 = vadd.s32 1, %v2537_v27  ;;  %v130_v43 = vadd.s32 1, %v2552_v36  ;;  %vm877_vm12 = vcmp.lt.s32.totalorder %v2519_v18, 6  ;;  %vm864_vm0 = vcmp.lt.s32.totalorder %v2519_v18, 2 }
   0x9   :  { %vm99_vm5 = vcmp.ge.s32.totalorder %v95_v55, 0  ;;  %v97_v2 = vadd.s32 4294967295, %v2598_v61 }
   0xa   :  { %vm136_vm3 = vcmp.lt.s32.totalorder %v128_v35, 16  ;;  %vm138_vm4 = vcmp.lt.s32.totalorder %v130_v43, 16  ;;  %v1776_v63 = vsel %vm99_vm5, 1.0, %v2410_v46  ;;  %v648_v35 = vld [vmem:[%s2993_s7] sm:$0xff] }
   0xb   :  { %2193 = vmatpush3.bf16.msra.mxu1 %v2190_v10  ;;  %v1778_v47 = vsel %vm136_vm3, 1.0, %v2410_v46  ;;  %v1779_v51 = vsel %vm138_vm4, 1.0, %v2410_v46  ;;  %vm101_vm11 = vcmp.ge.s32.totalorder %v97_v2, 0  ;;  %v756_v2 = vld [vmem:[%s2995_s5] sm:$0xff] }
   0xc   :  { %2195 = vmatprep.subr.bf16.mxu1 %v2194_v13  ;;  %v1777_v12 = vsel %vm101_vm11, 1.0, %v2410_v46 }
   0xf   :  { %2197 = vmatpush3.bf16.msra.mxu1 %v2194_v13 }
  0x10   :  { %2199 = vmatprep.subr.bf16.mxu1 %v2198_v17 }
  0x13   :  { %2201 = vmatpush3.bf16.msra.mxu1 %v2198_v17 }
  0x14   :  { %2203 = vmatprep.subr.bf16.mxu1 %v2202_v21 }
  0x17   :  { %2205 = vmatpush3.bf16.msra.mxu1 %v2202_v21 }
  0x18   :  { %2207 = vmatprep.subr.bf16.mxu1 %v2206_v25 }
  0x1b   :  { %2209 = vmatpush3.bf16.msra.mxu1 %v2206_v25 }
  0x1c   :  { %2030 = vmatprep.subr.mxu1 %v494_v33 }
  0x1f   :  { %2031 = vmatpush3.msra.mxu1 %v494_v33 }
  0x74   :  { %v2594_v59 = vpop.permute.xlu1 %457 }
  0x76   :  { %v2590_v56 = vpop.permute.xlu0 %455 }
  0xd7   :  { %v2002_v29 = vpop.f32.mrb[0].mxu0 }
  0xd8   :  { %v2540_v30 = vadd.f32 %v2002_v29, %v1788_v26  ;;  %v378_v31 = vpop.f32.mrb[1].mxu0 }
  0xd9   :  { %v2542_v32 = vadd.f32 %v1788_v26, %v378_v31 }
  0xda   :  { %429 = vrot.lane.b32.xlu0 %v2540_v30, %s2408_s0  ;;  %v411_v34 = vrot.slane %v2540_v30, 1  ;;  %v398_v8 = vrot.slane %v2540_v30, 7 }
  0xdb   :  { %v2005_v37 = vpop.f32.mrb[2].mxu0  ;;  %v410_v38 = vrot.slane %v2542_v32, 1  ;;  %v397_v60 = vrot.slane %v2542_v32, 7 }
  0xdc   :  { %v388_v39 = vpop.f32.mrb[3].mxu0  ;;  %v2555_v40 = vadd.f32 %v2005_v37, %v1788_v26  ;;  %v649_v37 = vld [vmem:[%s2993_s7 + $0x8] sm:$0xff] }
  0xdd   :  { %v2557_v41 = vadd.f32 %v1788_v26, %v388_v39  ;;  %v417_v42 = vsel %vm414_vm2, %v410_v38, %v411_v34  ;;  %v404_v14 = vsel %vm401_vm6, %v397_v60, %v398_v8  ;;  %v1794_v39 = vld [vmem:[%s2994_s4] ss:$0 sm:$0xff] }
  0xde   :  { %427 = vrot.lane.b32.xlu0 %v2542_v32, %s2408_s0  ;;  %443 = vrot.lane.b32.xlu1 %v417_v42, %s2409_s2  ;;  %v413_v45 = vrot.slane %v2555_v40, 1  ;;  %v400_v58 = vrot.slane %v2555_v40, 7 }
  0xdf   :  { %v412_v44 = vrot.slane %v2557_v41, 1  ;;  %v399_v6 = vrot.slane %v2557_v41, 7 }
  0xe0   :  { %v418_v52 = vsel %vm414_vm2, %v413_v45, %v410_v38  ;;  %v405_v0 = vsel %vm401_vm6, %v400_v58, %v397_v60  ;;  %v2210_v38 = vpack.c.bf16 %v649_v37, %v648_v35  ;;  %v1814_v35 = vld [vmem:[%s2991_s3 + $0x70] sm:$0xff]  ;;  %v1815_v37 = vld [vmem:[%s2991_s3 + $0x78] sm:$0xff] }
  0xe1   :  { %v416_v48 = vsel %vm414_vm2, %v411_v34, %v412_v44  ;;  %v415_v50 = vsel %vm414_vm2, %v412_v44, %v413_v45  ;;  %v422_v53 = vmul.f32 %v1779_v51, %v418_v52  ;;  %v406_v1 = vmul.f32 %v1776_v63, %v405_v0 }
  0xe2   :  { %431 = vrot.lane.b32.xlu0 %v2557_v41, %s2408_s0  ;;  %433 = vrot.lane.b32.xlu1 %v2555_v40, %s2408_s0  ;;  %v420_v49 = vmul.f32 %v1778_v47, %v416_v48  ;;  %v403_v13 = vsel %vm401_vm6, %v398_v8, %v399_v6  ;;  %v402_v28 = vsel %vm401_vm6, %v399_v6, %v400_v58  ;;  %v651_v58 = vld [vmem:[%s2993_s7 + $0x18] sm:$0xff]  ;;  %vm1321_vm2 = vcmp.lt.s32.totalorder %v2519_v18, 4 }
  0xe3   :  { %v408_v19 = vmul.f32 %v1777_v12, %v403_v13  ;;  %2211 = vmatprep.subr.bf16.mxu0 %v2210_v38  ;;  %v225_v18 = vadd.s32 4294967292, %v2598_v61 }
  0xe4   :  { %2213 = vmatpush3.bf16.msra.mxu0 %v2210_v38 }
  0xe5   :  { %vm229_vm6 = vcmp.ge.s32.totalorder %v225_v18, 0 }
  0xe6   :  { %447 = vrot.lane.b32.xlu0 %v415_v50, %s2409_s2  ;;  %445 = vrot.lane.b32.xlu1 %v420_v49, %s2409_s2 }
  0xea   :  { %459 = vrot.lane.b32.xlu0 %v2484_v3, %s2407_s25  ;;  %449 = vrot.lane.b32.xlu1 %v422_v53, %s2409_s2 }
  0xee   :  { %461 = vrot.lane.b32.xlu1 %v2492_v4, %s2407_s25 }
 0x14c   :  { %v430_v62 = vpop.permute.xlu0 %429 }
 0x14d   :  { %v469_v15 = vsel %vm467_vm8, %v404_v14, %v430_v62  ;;  %v2214_v62 = vpack.c.bf16 %v651_v58, %v650_v57  ;;  %v758_v14 = vld [vmem:[%s2995_s5 + $0x10] sm:$0xff] }
 0x14f   :  { %2215 = vmatprep.subr.bf16.mxu0 %v2214_v62 }
 0x150   :  { %v428_v3 = vpop.permute.xlu0 %427  ;;  %v444_v4 = vpop.permute.xlu1 %443  ;;  %2217 = vmatpush3.bf16.msra.mxu0 %v2214_v62 }
 0x151   :  { %v468_v5 = vsel %vm467_vm8, %v406_v1, %v428_v3  ;;  %v757_v3 = vld [vmem:[%s2995_s5 + $0x8] sm:$0xff] }
 0x152   :  { %v473_v7 = vsel %vm472_vm7, %v468_v5, %v444_v4  ;;  %v2218_v5 = vpack.c.bf16 %v757_v3, %v756_v2  ;;  %v192_v3 = vadd.s32 2, %v2537_v27 }
 0x153   :  { %v478_v9 = vsel %vm477_vm9, %v473_v7, %v2590_v56 }
 0x154   :  { %v432_v10 = vpop.permute.xlu0 %431  ;;  %v434_v11 = vpop.permute.xlu1 %433  ;;  %2032 = vmatprep.mubr.msk.f32.mxu1 %vm502_vm10, %v478_v9  ;;  %2219 = vmatprep.subr.bf16.mxu0 %v2218_v5  ;;  %vm200_vm13 = vcmp.lt.s32.totalorder %v192_v3, 16 }
 0x155   :  { %v470_v22 = vsel %vm467_vm8, %v408_v19, %v432_v10  ;;  %v471_v29 = vsel %vm467_vm8, %v402_v28, %v434_v11 }
 0x158   :  { %v448_v16 = vpop.permute.xlu0 %447  ;;  %v446_v17 = vpop.permute.xlu1 %445 }
 0x159   :  { %v474_v20 = vsel %vm472_vm7, %v469_v15, %v446_v17  ;;  %v475_v23 = vsel %vm472_vm7, %v470_v22, %v448_v16  ;;  %v759_v15 = vld [vmem:[%s2995_s5 + $0x18] sm:$0xff] }
 0x15a   :  { %v479_v21 = vsel %vm477_vm9, %v474_v20, %v2594_v59  ;;  %v2222_v22 = vpack.c.bf16 %v759_v15, %v758_v14 }
 0x15b   :  { %2033 = vmatmul.mubr.msk.f32.vlgmr.msra.gmra.mrb[0].mxu1 %vm502_vm10, %v479_v21 }
 0x15c   :  { %v2623_v24 = vpop.permute.xlu0 %459  ;;  %v450_v25 = vpop.permute.xlu1 %449 }
 0x15d   :  { %v480_v26 = vsel %vm477_vm9, %v475_v23, %v2623_v24  ;;  %v476_v31 = vsel %vm472_vm7, %v471_v29, %v450_v25 }
 0x15e   :  { %2035 = vmatprep.mubr.msk.f32.mxu1 %vm502_vm10, %v480_v26 }
 0x160   :  { %v2632_v33 = vpop.permute.xlu1 %461 }
 0x161   :  { %v481_v34 = vsel %vm477_vm9, %v476_v31, %v2632_v33 }
 0x162   :  { %2036 = vmatmul.mubr.msk.f32.gmra.mrb[2].mxu1 %vm502_vm10, %v481_v34  ;;  %v1813_v34 = vld [vmem:[%s2991_s3 + $0x68] sm:$0xff] }
 0x163   :  { %v2226_v38 = vpack.c.bf16 %v1814_v35, %v1813_v34 }
 0x22e   :  { %v2034_v42 = vpop.f32.mrb[0].mxu1 }
 0x22f   :  { %v587_v43 = vadd.f32 %v2034_v42, %v1794_v39  ;;  %v581_v44 = vpop.f32.mrb[1].mxu1 }
 0x230   :  { %v582_v45 = vadd.f32 %v1794_v39, %v581_v44  ;;  %v1818_v44 = vld [vmem:[%s2991_s3 + $0x90] sm:$0xff] }
 0x231   :  { %v1800_v47 = vmul.f32 -1.442695, %v587_v43 }
 0x232   :  { %v1799_v48 = vmul.f32 -1.442695, %v582_v45 }
 0x233   :  { %2335 = vpow2.f32 %v1800_v47  ;;  %v1819_v47 = vld [vmem:[%s2991_s3 + $0x98] sm:$0xff] }
 0x234   :  { %2337 = vpow2.f32 %v1799_v48  ;;  %v1820_v48 = vld [vmem:[%s2991_s3 + $0xa0] sm:$0xff] }
 0x235   :  { %v2037_v49 = vpop.f32.mrb[2].mxu1 }
 0x236   :  { %v597_v50 = vadd.f32 %v2037_v49, %v1794_v39  ;;  %v591_v51 = vpop.f32.mrb[3].mxu1  ;;  %v2238_v49 = vpack.c.bf16 %v1820_v48, %v1819_v47 }
 0x237   :  { %v592_v52 = vadd.f32 %v1794_v39, %v591_v51  ;;  %v1816_v39 = vld [vmem:[%s2991_s3 + $0x80] sm:$0xff]  ;;  %v1822_v51 = vld [vmem:[%s2991_s3 + $0xb0] sm:$0xff] }
 0x238   :  { %v1802_v53 = vmul.f32 -1.442695, %v597_v50  ;;  %v2230_v42 = vpack.c.bf16 %v1816_v39, %v1815_v37 }
 0x239   :  { %v1801_v55 = vmul.f32 -1.442695, %v592_v52 }
 0x23a   :  { %2339 = vpow2.f32 %v1802_v53  ;;  %v1823_v53 = vld [vmem:[%s2991_s3 + $0xb8] sm:$0xff] }
 0x23b   :  { %2341 = vpow2.f32 %v1801_v55  ;;  %v1824_v55 = vld [vmem:[%s2991_s3 + $0xc0] sm:$0xff] }
 0x23c   :  { %v2246_v57 = vpack.c.bf16 %v1824_v55, %v1823_v53 }
 0x23d   :  { %v2336_v60 = vpop.eup %2335 }
 0x23e   :  { %v2338_v63 = vpop.eup %2337  ;;  %v617_v0 = vadd.f32 1.0, %v2336_v60  ;;  %v1812_v60 = vld [vmem:[%s2996_s6] ss:$0 sm:$0xff] }
 0x23f   :  { %v616_v1 = vadd.f32 1.0, %v2338_v63 }
 0x240   :  { %2343 = vrcp.f32 %v617_v0 }
 0x241   :  { %2345 = vrcp.f32 %v616_v1  ;;  %v1825_v1 = vld [vmem:[%s2991_s3 + $0xc8] sm:$0xff] }
 0x244   :  { %v2340_v4 = vpop.eup %2339 }
 0x245   :  { %v2342_v6 = vpop.eup %2341  ;;  %v619_v7 = vadd.f32 1.0, %v2340_v4 }
 0x246   :  { %v618_v8 = vadd.f32 1.0, %v2342_v6 }
 0x247   :  { %2347 = vrcp.f32 %v619_v7 }
 0x248   :  { %2349 = vrcp.f32 %v618_v8 }
 0x249   :  { %2351 = vtanh.f32 %v582_v45 }
 0x24a   :  { %v2344_v9 = vpop.eup %2343  ;;  %2353 = vtanh.f32 %v587_v43  ;;  %v1817_v43 = vld [vmem:[%s2991_s3 + $0x88] sm:$0xff] }
 0x24b   :  { %v2346_v10 = vpop.eup %2345  ;;  %634 = vrot.lane.b32.xlu1 %v2344_v9, %s2411_s29  ;;  %2355 = vtanh.f32 %v592_v52  ;;  %v2234_v45 = vpack.c.bf16 %v1818_v44, %v1817_v43 }
 0x24c   :  { %632 = vrot.lane.b32.xlu0 %v2346_v10, %s2411_s29  ;;  %2357 = vtanh.f32 %v597_v50  ;;  %v1821_v50 = vld [vmem:[%s2991_s3 + $0xa8] sm:$0xff] }
 0x24d   :  { %v2242_v52 = vpack.c.bf16 %v1822_v51, %v1821_v50 }
 0x251   :  { %v2348_v11 = vpop.eup %2347 }
 0x252   :  { %v2350_v12 = vpop.eup %2349  ;;  %638 = vrot.lane.b32.xlu1 %v2348_v11, %s2411_s29 }
 0x253   :  { %636 = vrot.lane.b32.xlu0 %v2350_v12, %s2411_s29  ;;  %v2352_v16 = vpop.eup %2351 }
 0x254   :  { %v2354_v19 = vpop.eup %2353 }
 0x255   :  { %v2356_v25 = vpop.eup %2355 }
 0x256   :  { %v2358_v28 = vpop.eup %2357 }
 0x2bd   :  { %v635_v13 = vpop.permute.xlu1 %634 }
 0x2be   :  { %v633_v17 = vpop.permute.xlu0 %632  ;;  %v645_v21 = vmul.f32 %v2354_v19, %v635_v13 }
 0x2bf   :  { %v644_v20 = vmul.f32 %v2352_v16, %v633_v17 }
 0x2c1   :  { %2046 = vmatprep.mubr.msk.f32.mxu0 %vm467_vm8, %v644_v20 }
 0x2c2   :  { %2047 = vmatmul.mubr.msk.f32.vlgmr.msra.gmra.mrb[4].mxu0 %vm467_vm8, %v645_v21 }
 0x2c3   :  { %2221 = vmatpush3.bf16.msra.mxu0 %v2218_v5 }
 0x2c4   :  { %v639_v23 = vpop.permute.xlu1 %638  ;;  %2223 = vmatprep.subr.bf16.mxu0 %v2222_v22 }
 0x2c5   :  { %v637_v26 = vpop.permute.xlu0 %636  ;;  %v647_v31 = vmul.f32 %v2358_v28, %v639_v23 }
 0x2c6   :  { %v646_v29 = vmul.f32 %v2356_v25, %v637_v26 }
 0x2c7   :  { %2225 = vmatpush3.bf16.msra.mxu0 %v2222_v22 }
 0x2c8   :  { %2049 = vmatprep.mubr.msk.f32.mxu0 %vm467_vm8, %v646_v29  ;;  %2227 = vmatprep.subr.bf16.mxu0 %v2226_v38 }
 0x2c9   :  { %2050 = vmatmul.mubr.msk.f32.gmra.mrb[6].mxu0 %vm467_vm8, %v647_v31 }
 0x2ca   :  { %2060 = vmatprep.mubr.msk.f32.mxu0 %vm467_vm8, %v644_v20 }
 0x2cd   :  { %2061 = vmatmul.mubr.msk.f32.vlgmr.msra.gmra.mrb[8].mxu0 %vm467_vm8, %v645_v21  ;;  %v159_v21 = vadd.s32 4294967294, %v2587_v54 }
 0x2ce   :  { %2063 = vmatprep.mubr.msk.f32.mxu0 %vm467_vm8, %v646_v29  ;;  %2229 = vmatpush3.bf16.msra.mxu0 %v2226_v38 }
 0x2cf   :  { %2231 = vmatprep.subr.bf16.mxu0 %v2230_v42  ;;  %vm163_vm15 = vcmp.ge.s32.totalorder %v159_v21, 0 }
 0x2d0   :  { %v1780_v26 = vsel %vm163_vm15, 1.0, %v2410_v46 }
 0x2d1   :  { %2064 = vmatmul.mubr.msk.f32.gmra.mrb[10].mxu0 %vm467_vm8, %v647_v31  ;;  %v161_v31 = vadd.s32 4294967294, %v2598_v61 }
 0x2d2   :  { %2233 = vmatpush3.bf16.msra.mxu0 %v2230_v42 }
 0x2d3   :  { %2235 = vmatprep.subr.bf16.mxu0 %v2234_v45  ;;  %vm165_vm1 = vcmp.ge.s32.totalorder %v161_v31, 0  ;;  %v1839_v31 = vld [vmem:[%s2993_s7 + $0x38] sm:$0xff] }
 0x2d6   :  { %2237 = vmatpush3.bf16.msra.mxu0 %v2234_v45  ;;  %v1781_v45 = vsel %vm165_vm1, 1.0, %v2410_v46 }
 0x2d7   :  { %2239 = vmatprep.subr.bf16.mxu0 %v2238_v49 }
 0x2da   :  { %2241 = vmatpush3.bf16.msra.mxu0 %v2238_v49 }
 0x2db   :  { %2243 = vmatprep.subr.bf16.mxu0 %v2242_v52 }
 0x2de   :  { %2245 = vmatpush3.bf16.msra.mxu0 %v2242_v52 }
 0x2df   :  { %2247 = vmatprep.subr.bf16.mxu0 %v2246_v57 }
 0x2e2   :  { %2249 = vmatpush3.bf16.msra.mxu0 %v2246_v57 }
 0x2e3   :  { %2090 = vmatprep.subr.mxu0 %v1825_v1 }
 0x2e6   :  { %2091 = vmatpush3.msra.mxu0 %v1825_v1 }
 0x3a0   :  { %v2062_v58 = vpop.f32.mrb[8].mxu0 }
 0x3a1   :  { %v846_v62 = vadd.f32 %v2062_v58, %v2540_v30  ;;  %v826_v63 = vpop.f32.mrb[9].mxu0 }
 0x3a2   :  { %v845_v0 = vadd.f32 %v826_v63, %v2542_v32 }
 0x3a3   :  { %v2720_v2 = vadd.f32 %v1812_v60, %v846_v62 }
 0x3a4   :  { %v2723_v4 = vadd.f32 %v1812_v60, %v845_v0  ;;  %v2065_v5 = vpop.f32.mrb[10].mxu0 }
 0x3a5   :  { %v848_v6 = vadd.f32 %v2065_v5, %v2555_v40  ;;  %892 = vrot.lane.b32.xlu1 %v2720_v2, %s2408_s0  ;;  %v836_v30 = vpop.f32.mrb[11].mxu0  ;;  %v874_v32 = vrot.slane %v2720_v2, 2  ;;  %v194_v40 = vadd.s32 2, %v2552_v36  ;;  %v861_v37 = vrot.slane %v2720_v2, 6 }
 0x3a6   :  { %v847_v7 = vadd.f32 %v836_v30, %v2557_v41  ;;  %890 = vrot.lane.b32.xlu0 %v2723_v4, %s2408_s0  ;;  %v873_v8 = vrot.slane %v2723_v4, 2  ;;  %v1782_v41 = vsel %vm200_vm13, 1.0, %v2410_v46  ;;  %v860_v23 = vrot.slane %v2723_v4, 6  ;;  %v1847_v30 = vld [vmem:[%s2995_s5 + $0x28] sm:$0xff] }
 0x3a7   :  { %v2734_v9 = vadd.f32 %v1812_v60, %v848_v6  ;;  %vm202_vm14 = vcmp.lt.s32.totalorder %v194_v40, 16  ;;  %v1846_v6 = vld [vmem:[%s2995_s5 + $0x20] sm:$0xff]  ;;  %v1848_v40 = vld [vmem:[%s2995_s5 + $0x30] sm:$0xff] }
 0x3a8   :  { %v2737_v10 = vadd.f32 %v1812_v60, %v847_v7  ;;  %v880_v11 = vsel %vm877_vm12, %v873_v8, %v874_v32  ;;  %v1783_v16 = vsel %vm202_vm14, 1.0, %v2410_v46  ;;  %v867_v48 = vsel %vm864_vm0, %v860_v23, %v861_v37 }
 0x3a9   :  { %896 = vrot.lane.b32.xlu1 %v2734_v9, %s2408_s0  ;;  %v876_v13 = vrot.slane %v2734_v9, 2  ;;  %v863_v22 = vrot.slane %v2734_v9, 6  ;;  %v2258_v7 = vpack.c.bf16 %v1847_v30, %v1846_v6  ;;  %v1857_v6 = vld [vmem:[%s2991_s3 + $0xd8] sm:$0xff]  ;;  %v1858_v30 = vld [vmem:[%s2991_s3 + $0xe0] sm:$0xff] }
 0x3aa   :  { %906 = vrot.lane.b32.xlu0 %v880_v11, %s2409_s2  ;;  %v875_v12 = vrot.slane %v2737_v10, 2  ;;  %v862_v35 = vrot.slane %v2737_v10, 6  ;;  %v1849_v11 = vld [vmem:[%s2995_s5 + $0x38] sm:$0xff] }
 0x3ab   :  { %v881_v17 = vsel %vm877_vm12, %v876_v13, %v873_v8  ;;  %v868_v28 = vsel %vm864_vm0, %v863_v22, %v860_v23  ;;  %v1837_v8 = vld [vmem:[%s2993_s7 + $0x28] sm:$0xff]  ;;  %2259 = vmatprep.subr.bf16.mxu1 %v2258_v7 }
 0x3ac   :  { %v879_v14 = vsel %vm877_vm12, %v874_v32, %v875_v12  ;;  %v878_v19 = vsel %vm877_vm12, %v875_v12, %v876_v13  ;;  %v885_v20 = vmul.f32 %v1783_v16, %v881_v17  ;;  %v869_v34 = vmul.f32 %v1780_v26, %v868_v28  ;;  %v1836_v32 = vld [vmem:[%s2993_s7 + $0x20] sm:$0xff]  ;;  %2261 = vmatpush3.bf16.msra.mxu1 %v2258_v7  ;;  %v1859_v7 = vld [vmem:[%s2991_s3 + $0xe8] sm:$0xff] }
 0x3ad   :  { %v883_v15 = vmul.f32 %v1782_v41, %v879_v14  ;;  %v866_v47 = vsel %vm864_vm0, %v861_v37, %v862_v35  ;;  %v865_v57 = vsel %vm864_vm0, %v862_v35, %v863_v22  ;;  %v2250_v41 = vpack.c.bf16 %v1837_v8, %v1836_v32  ;;  %v1827_v13 = vld [vmem:[%s2994_s4 + $0x1] ss:$0 sm:$0xff] }
 0x3ae   :  { %894 = vrot.lane.b32.xlu0 %v2737_v10, %s2408_s0  ;;  %v871_v52 = vmul.f32 %v1781_v45, %v866_v47  ;;  %v2262_v12 = vpack.c.bf16 %v1849_v11, %v1848_v40  ;;  %v2270_v8 = vpack.c.bf16 %v1859_v7, %v1858_v30  ;;  %v1860_v40 = vld [vmem:[%s2991_s3 + $0xf0] sm:$0xff]  ;;  %v1861_v11 = vld [vmem:[%s2991_s3 + $0xf8] sm:$0xff] }
 0x3af   :  { %908 = vrot.lane.b32.xlu1 %v883_v15, %s2409_s2  ;;  %2251 = vmatprep.subr.bf16.mxu0 %v2250_v41 }
 0x3b0   :  { %2263 = vmatprep.subr.bf16.mxu1 %v2262_v12 }
 0x3b1   :  { %2265 = vmatpush3.bf16.msra.mxu1 %v2262_v12  ;;  %v1862_v12 = vld [vmem:[%s2991_s3 + $0x100] sm:$0xff] }
 0x3b2   :  { %910 = vrot.lane.b32.xlu0 %v878_v19, %s2409_s2 }
 0x3b3   :  { %912 = vrot.lane.b32.xlu1 %v885_v20, %s2409_s2 }
 0x417   :  { %v893_v25 = vpop.permute.xlu1 %892 }
 0x418   :  { %v891_v29 = vpop.permute.xlu0 %890  ;;  %v919_v50 = vsel %vm467_vm8, %v867_v48, %v893_v25 }
 0x419   :  { %v918_v38 = vsel %vm467_vm8, %v869_v34, %v891_v29  ;;  %v1838_v29 = vld [vmem:[%s2993_s7 + $0x30] sm:$0xff] }
 0x41a   :  { %v2254_v35 = vpack.c.bf16 %v1839_v31, %v1838_v29  ;;  %v1868_v29 = vld [vmem:[%s2991_s3 + $0x130] sm:$0xff] }
 0x41b   :  { %v897_v42 = vpop.permute.xlu1 %896 }
 0x41c   :  { %v907_v39 = vpop.permute.xlu0 %906  ;;  %v921_v62 = vsel %vm467_vm8, %v865_v57, %v897_v42 }
 0x41d   :  { %v922_v43 = vsel %vm472_vm7, %v918_v38, %v907_v39 }
 0x41e   :  { %v926_v44 = vsel %vm477_vm9, %v922_v43, %v2590_v56 }
 0x41f   :  { %2092 = vmatprep.mubr.msk.f32.mxu0 %vm502_vm10, %v926_v44 }
 0x420   :  { %v895_v49 = vpop.permute.xlu0 %894 }
 0x421   :  { %v909_v51 = vpop.permute.xlu1 %908  ;;  %v920_v58 = vsel %vm467_vm8, %v871_v52, %v895_v49 }
 0x422   :  { %v923_v53 = vsel %vm472_vm7, %v919_v50, %v909_v51 }
 0x423   :  { %v927_v55 = vsel %vm477_vm9, %v923_v53, %v2594_v59 }
 0x424   :  { %2093 = vmatmul.mubr.msk.f32.vlgmr.msra.gmra.mrb[12].mxu0 %vm502_vm10, %v927_v55  ;;  %v911_v60 = vpop.permute.xlu0 %910 }
 0x425   :  { %v924_v63 = vsel %vm472_vm7, %v920_v58, %v911_v60  ;;  %v913_v0 = vpop.permute.xlu1 %912  ;;  %2253 = vmatpush3.bf16.msra.mxu0 %v2250_v41  ;;  %v2274_v41 = vpack.c.bf16 %v1861_v11, %v1860_v40 }
 0x426   :  { %v925_v1 = vsel %vm472_vm7, %v921_v62, %v913_v0  ;;  %v928_v3 = vsel %vm477_vm9, %v924_v63, %v2623_v24  ;;  %2255 = vmatprep.subr.bf16.mxu0 %v2254_v35 }
 0x427   :  { %2095 = vmatprep.mubr.msk.f32.mxu0 %vm502_vm10, %v928_v3  ;;  %v929_v5 = vsel %vm477_vm9, %v925_v1, %v2632_v33 }
 0x428   :  { %2096 = vmatmul.mubr.msk.f32.gmra.mrb[14].mxu0 %vm502_vm10, %v929_v5  ;;  %v1856_v5 = vld [vmem:[%s2991_s3 + $0xd0] sm:$0xff] }
 0x429   :  { %2257 = vmatpush3.bf16.msra.mxu0 %v2254_v35  ;;  %v2266_v32 = vpack.c.bf16 %v1857_v6, %v1856_v5 }
 0x42b   :  { %2267 = vmatprep.subr.bf16.mxu1 %v2266_v32 }
 0x4f7   :  { %v2094_v14 = vpop.f32.mrb[12].mxu0 }
 0x4f8   :  { %v1036_v15 = vadd.f32 %v2094_v14, %v1827_v13  ;;  %v1030_v16 = vpop.f32.mrb[13].mxu0 }
 0x4f9   :  { %v1031_v17 = vadd.f32 %v1827_v13, %v1030_v16  ;;  %v1865_v16 = vld [vmem:[%s2991_s3 + $0x118] sm:$0xff] }
 0x4fa   :  { %v1833_v19 = vmul.f32 -1.442695, %v1036_v15 }
 0x4fb   :  { %v1832_v20 = vmul.f32 -1.442695, %v1031_v17  ;;  %v2097_v21 = vpop.f32.mrb[14].mxu0 }
 0x4fc   :  { %2359 = vpow2.f32 %v1833_v19  ;;  %v1046_v22 = vadd.f32 %v2097_v21, %v1827_v13  ;;  %v1040_v23 = vpop.f32.mrb[15].mxu0  ;;  %v1866_v19 = vld [vmem:[%s2991_s3 + $0x120] sm:$0xff] }
 0x4fd   :  { %2361 = vpow2.f32 %v1832_v20  ;;  %v1041_v25 = vadd.f32 %v1827_v13, %v1040_v23  ;;  %v1863_v13 = vld [vmem:[%s2991_s3 + $0x108] sm:$0xff]  ;;  %v1855_v23 = vld [vmem:[%s2996_s6 + $0x1] ss:$0 sm:$0xff] }
 0x4fe   :  { %v1835_v26 = vmul.f32 -1.442695, %v1046_v22  ;;  %v2278_v14 = vpack.c.bf16 %v1863_v13, %v1862_v12  ;;  %v1867_v20 = vld [vmem:[%s2991_s3 + $0x128] sm:$0xff]  ;;  %v1879_v13 = vld [vmem:[%s2993_s7 + $0x40] sm:$0xff] }
 0x4ff   :  { %v1834_v28 = vmul.f32 -1.442695, %v1041_v25  ;;  %v2286_v21 = vpack.c.bf16 %v1867_v20, %v1866_v19 }
 0x500   :  { %2363 = vpow2.f32 %v1835_v26 }
 0x501   :  { %2365 = vpow2.f32 %v1834_v28 }
 0x506   :  { %v2360_v34 = vpop.eup %2359 }
 0x507   :  { %v2362_v37 = vpop.eup %2361  ;;  %v1066_v38 = vadd.f32 1.0, %v2360_v34  ;;  %v256_v34 = vadd.s32 4, %v2537_v27  ;;  %v258_v27 = vadd.s32 4, %v2552_v36 }
 0x508   :  { %v1065_v39 = vadd.f32 1.0, %v2362_v37 }
 0x509   :  { %2367 = vrcp.f32 %v1066_v38  ;;  %vm264_vm3 = vcmp.lt.s32.totalorder %v256_v34, 16  ;;  %vm266_vm4 = vcmp.lt.s32.totalorder %v258_v27, 16 }
 0x50a   :  { %v2364_v42 = vpop.eup %2363  ;;  %2369 = vrcp.f32 %v1065_v39 }
 0x50b   :  { %v2366_v43 = vpop.eup %2365  ;;  %v1068_v44 = vadd.f32 1.0, %v2364_v42 }
 0x50c   :  { %v1067_v45 = vadd.f32 1.0, %v2366_v43 }
 0x50d   :  { %2371 = vrcp.f32 %v1068_v44 }
 0x50e   :  { %2373 = vrcp.f32 %v1067_v45 }
 0x50f   :  { %2375 = vtanh.f32 %v1031_v17 }
 0x510   :  { %2377 = vtanh.f32 %v1036_v15  ;;  %v1864_v15 = vld [vmem:[%s2991_s3 + $0x110] sm:$0xff] }
 0x511   :  { %2379 = vtanh.f32 %v1041_v25  ;;  %v2282_v17 = vpack.c.bf16 %v1865_v16, %v1864_v15  ;;  %v1881_v15 = vld [vmem:[%s2993_s7 + $0x50] sm:$0xff]  ;;  %v1882_v16 = vld [vmem:[%s2993_s7 + $0x58] sm:$0xff] }
 0x512   :  { %2381 = vtanh.f32 %v1046_v22 }
 0x513   :  { %v2368_v47 = vpop.eup %2367 }
 0x514   :  { %v2370_v48 = vpop.eup %2369  ;;  %1083 = vrot.lane.b32.xlu1 %v2368_v47, %s2411_s29 }
 0x515   :  { %1081 = vrot.lane.b32.xlu0 %v2370_v48, %s2411_s29  ;;  %v1786_v48 = vsel %vm264_vm3, 1.0, %v2410_v46 }
 0x517   :  { %v2372_v49 = vpop.eup %2371 }
 0x518   :  { %v2374_v50 = vpop.eup %2373  ;;  %1087 = vrot.lane.b32.xlu1 %v2372_v49, %s2411_s29 }
 0x519   :  { %1085 = vrot.lane.b32.xlu0 %v2374_v50, %s2411_s29  ;;  %v2376_v52 = vpop.eup %2375 }
 0x51a   :  { %v2378_v55 = vpop.eup %2377 }
 0x51b   :  { %v2380_v62 = vpop.eup %2379 }
 0x51c   :  { %v2382_v0 = vpop.eup %2381 }
 0x586   :  { %v1084_v51 = vpop.permute.xlu1 %1083 }
 0x587   :  { %v1082_v53 = vpop.permute.xlu0 %1081  ;;  %v1094_v58 = vmul.f32 %v2378_v55, %v1084_v51  ;;  %v1787_v51 = vsel %vm266_vm4, 1.0, %v2410_v46 }
 0x588   :  { %v1093_v57 = vmul.f32 %v2376_v52, %v1082_v53  ;;  %v223_v53 = vadd.s32 4294967292, %v2587_v54  ;;  %v1785_v54 = vsel %vm229_vm6, 1.0, %v2410_v46 }
 0x58a   :  { %2106 = vmatprep.mubr.msk.f32.mxu0 %vm467_vm8, %v1093_v57  ;;  %2120 = vmatprep.mubr.msk.f32.mxu1 %vm467_vm8, %v1093_v57  ;;  %v1088_v60 = vpop.permute.xlu1 %1087  ;;  %vm227_vm5 = vcmp.ge.s32.totalorder %v223_v53, 0 }
 0x58b   :  { %2107 = vmatmul.mubr.msk.f32.vlgmr.msra.gmra.mrb[4].mxu0 %vm467_vm8, %v1094_v58  ;;  %2121 = vmatmul.mubr.msk.f32.vlgmr.msra.gmra.mrb[4].mxu1 %vm467_vm8, %v1094_v58  ;;  %v1086_v63 = vpop.permute.xlu0 %1085  ;;  %v1096_v3 = vmul.f32 %v2382_v0, %v1088_v60  ;;  %v1784_v55 = vsel %vm227_vm5, 1.0, %v2410_v46 }
 0x58c   :  { %v1095_v1 = vmul.f32 %v2380_v62, %v1086_v63  ;;  %2269 = vmatpush3.bf16.msra.mxu1 %v2266_v32 }
 0x58d   :  { %2271 = vmatprep.subr.bf16.mxu1 %v2270_v8 }
 0x58e   :  { %2109 = vmatprep.mubr.msk.f32.mxu0 %vm467_vm8, %v1095_v1  ;;  %2123 = vmatprep.mubr.msk.f32.mxu1 %vm467_vm8, %v1095_v1 }
 0x58f   :  { %2110 = vmatmul.mubr.msk.f32.gmra.mrb[6].mxu0 %vm467_vm8, %v1096_v3  ;;  %2124 = vmatmul.mubr.msk.f32.gmra.mrb[6].mxu1 %vm467_vm8, %v1096_v3 }
 0x590   :  { %2273 = vmatpush3.bf16.msra.mxu1 %v2270_v8 }
 0x591   :  { %2275 = vmatprep.subr.bf16.mxu1 %v2274_v41 }
 0x594   :  { %2277 = vmatpush3.bf16.msra.mxu1 %v2274_v41 }
 0x595   :  { %2279 = vmatprep.subr.bf16.mxu1 %v2278_v14 }
 0x598   :  { %2281 = vmatpush3.bf16.msra.mxu1 %v2278_v14  ;;  %v1880_v14 = vld [vmem:[%s2993_s7 + $0x48] sm:$0xff] }
 0x599   :  { %2283 = vmatprep.subr.bf16.mxu1 %v2282_v17 }
 0x59c   :  { %2285 = vmatpush3.bf16.msra.mxu1 %v2282_v17  ;;  %v1870_v17 = vld [vmem:[%s2994_s4 + $0x2] ss:$0 sm:$0xff] }
 0x59d   :  { %2287 = vmatprep.subr.bf16.mxu1 %v2286_v21 }
 0x5a0   :  { %2289 = vmatpush3.bf16.msra.mxu1 %v2286_v21 }
 0x5a1   :  { %2150 = vmatprep.subr.mxu1 %v1868_v29 }
 0x5a4   :  { %2151 = vmatpush3.msra.mxu1 %v1868_v29 }
 0x65e   :  { %v2122_v22 = vpop.f32.mrb[4].mxu1 }
 0x65f   :  { %v1302_v25 = vadd.f32 %v2122_v22, %v2720_v2  ;;  %v1282_v26 = vpop.f32.mrb[5].mxu1 }
 0x660   :  { %v1301_v28 = vadd.f32 %v1282_v26, %v2723_v4 }
 0x661   :  { %v1314_v31 = vadd.f32 %v1855_v23, %v1302_v25 }
 0x662   :  { %v1313_v35 = vadd.f32 %v1855_v23, %v1301_v28  ;;  %v2125_v37 = vpop.f32.mrb[6].mxu1 }
 0x663   :  { %v1318_v38 = vrot.slane %v1314_v31, 4  ;;  %v1304_v39 = vadd.f32 %v2125_v37, %v2734_v9  ;;  %1340 = vrot.lane.b32.xlu1 %v1314_v31, %s2408_s0  ;;  %v1292_v2 = vpop.f32.mrb[7].mxu1 }
 0x664   :  { %v1317_v4 = vrot.slane %v1313_v35, 4  ;;  %v1303_v42 = vadd.f32 %v1292_v2, %v2737_v10  ;;  %1338 = vrot.lane.b32.xlu0 %v1313_v35, %s2408_s0 }
 0x665   :  { %v1316_v43 = vadd.f32 %v1855_v23, %v1304_v39 }
 0x666   :  { %v1315_v44 = vadd.f32 %v1855_v23, %v1303_v42  ;;  %v1324_v45 = vsel %vm1321_vm2, %v1317_v4, %v1318_v38 }
 0x667   :  { %v1320_v47 = vrot.slane %v1316_v43, 4  ;;  %1344 = vrot.lane.b32.xlu1 %v1316_v43, %s2408_s0 }
 0x668   :  { %v1319_v9 = vrot.slane %v1315_v44, 4  ;;  %1354 = vrot.lane.b32.xlu0 %v1324_v45, %s2409_s2 }
 0x669   :  { %v1325_v10 = vsel %vm1321_vm2, %v1320_v47, %v1317_v4 }
 0x66a   :  { %v1323_v49 = vsel %vm1321_vm2, %v1318_v38, %v1319_v9  ;;  %v1322_v36 = vsel %vm1321_vm2, %v1319_v9, %v1320_v47  ;;  %v1333_v52 = vmul.f32 %v1787_v51, %v1325_v10  ;;  %v1326_v60 = vmul.f32 %v1784_v55, %v1325_v10 }
 0x66b   :  { %v1331_v50 = vmul.f32 %v1786_v48, %v1323_v49  ;;  %v1328_v30 = vmul.f32 %v1785_v54, %v1323_v49  ;;  %v1803_v54 = vld [vmem:[%s2998_s8] ss:$0 sm:$0xff] }
 0x66c   :  { %1342 = vrot.lane.b32.xlu0 %v1315_v44, %s2408_s0  ;;  %v1659_v44 = vld [vmem:[%s2997_s9] sm:$0xff] }
 0x66d   :  { %1356 = vrot.lane.b32.xlu1 %v1331_v50, %s2409_s2 }
 0x670   :  { %1358 = vrot.lane.b32.xlu0 %v1322_v36, %s2409_s2 }
 0x671   :  { %1360 = vrot.lane.b32.xlu1 %v1333_v52, %s2409_s2 }
 0x6d5   :  { %v1341_v57 = vpop.permute.xlu1 %1340 }
 0x6d6   :  { %v1339_v58 = vpop.permute.xlu0 %1338  ;;  %v1367_v6 = vsel %vm467_vm8, %v1324_v45, %v1341_v57  ;;  %v1660_v45 = vld [vmem:[%s2997_s9 + $0x8] sm:$0xff] }
 0x6d7   :  { %v1366_v62 = vsel %vm467_vm8, %v1326_v60, %v1339_v58  ;;  %v2298_v47 = vpack.c.bf16 %v1660_v45, %v1659_v44 }
 0x6d9   :  { %v1345_v0 = vpop.permute.xlu1 %1344  ;;  %2306 = vmatprep.subr.bf16.mxu1 %v2298_v47 }
 0x6da   :  { %v1355_v63 = vpop.permute.xlu0 %1354 }
 0x6db   :  { %v1370_v1 = vsel %vm472_vm7, %v1366_v62, %v1355_v63 }
 0x6dc   :  { %v1374_v3 = vsel %vm477_vm9, %v1370_v1, %v2590_v56  ;;  %v1369_v56 = vsel %vm467_vm8, %v1322_v36, %v1345_v0  ;;  %v1661_v0 = vld [vmem:[%s2997_s9 + $0x10] sm:$0xff]  ;;  %v1662_v1 = vld [vmem:[%s2997_s9 + $0x18] sm:$0xff] }
 0x6dd   :  { %2152 = vmatprep.mubr.msk.f32.mxu1 %vm502_vm10, %v1374_v3  ;;  %v2302_v3 = vpack.c.bf16 %v1662_v1, %v1661_v0 }
 0x6de   :  { %v1343_v5 = vpop.permute.xlu0 %1342 }
 0x6df   :  { %v1357_v61 = vpop.permute.xlu1 %1356  ;;  %v1368_v8 = vsel %vm467_vm8, %v1328_v30, %v1343_v5  ;;  %v1841_v5 = vld [vmem:[%s2998_s8 + $0x1] ss:$0 sm:$0xff] }
 0x6e0   :  { %v1371_v32 = vsel %vm472_vm7, %v1367_v6, %v1357_v61  ;;  %v2313_v6 = vadd.f32 %v1841_v5, %v1803_v54  ;;  %v1884_v61 = vld [vmem:[%s2998_s8 + $0x2] ss:$0 sm:$0xff] }
 0x6e1   :  { %v1375_v7 = vsel %vm477_vm9, %v1371_v32, %v2594_v59 }
 0x6e2   :  { %2153 = vmatmul.mubr.msk.f32.vlgmr.msra.gmra.mrb[8].mxu1 %vm502_vm10, %v1375_v7  ;;  %v1359_v40 = vpop.permute.xlu0 %1358 }
 0x6e3   :  { %v1372_v46 = vsel %vm472_vm7, %v1368_v8, %v1359_v40  ;;  %v1361_v11 = vpop.permute.xlu1 %1360  ;;  %2308 = vmatpush3.bf16.msra.mxu1 %v2298_v47  ;;  %v2320_v40 = vadd.f32 %v2313_v6, %v1884_v61 }
 0x6e4   :  { %v1373_v41 = vsel %vm472_vm7, %v1369_v56, %v1361_v11  ;;  %v1376_v12 = vsel %vm477_vm9, %v1372_v46, %v2623_v24  ;;  %v2290_v24 = vpack.c.bf16 %v1880_v14, %v1879_v13  ;;  %2307 = vmatprep.subr.bf16.mxu1 %v2302_v3  ;;  %v1889_v13 = vld [vmem:[%s2999_s10] ss:$0 sm:$0xff]  ;;  %vm1767_vm7 = vcmask 64512  }
 0x6e5   :  { %2155 = vmatprep.mubr.msk.f32.mxu1 %vm502_vm10, %v1376_v12  ;;  %v1377_v59 = vsel %vm477_vm9, %v1373_v41, %v2632_v33  ;;  %v2294_v33 = vpack.c.bf16 %v1882_v16, %v1881_v15 }
 0x6e6   :  { %2156 = vmatmul.mubr.msk.f32.gmra.mrb[10].mxu1 %vm502_vm10, %v1377_v59  ;;  %2291 = vmatprep.subr.bf16.mxu0 %v2290_v24 }
 0x6e7   :  { %2293 = vmatpush3.bf16.msra.mxu0 %v2290_v24  ;;  %2309 = vmatpush3.bf16.msra.mxu1 %v2302_v3 }
 0x6e8   :  { %2295 = vmatprep.subr.bf16.mxu0 %v2294_v33 }
 0x6eb   :  { %2297 = vmatpush3.bf16.msra.mxu0 %v2294_v33 }
 0x6ec   :  { %2299 = vmatprep.subr.bf16.mxu0 %v2298_v47 }
 0x7b5   :  { %v2154_v19 = vpop.f32.mrb[8].mxu1 }
 0x7b6   :  { %v1484_v20 = vadd.f32 %v2154_v19, %v1870_v17  ;;  %v1478_v21 = vpop.f32.mrb[9].mxu1 }
 0x7b7   :  { %v1479_v22 = vadd.f32 %v1870_v17, %v1478_v21 }
 0x7b8   :  { %v1876_v23 = vmul.f32 -1.442695, %v1484_v20 }
 0x7b9   :  { %v1875_v25 = vmul.f32 -1.442695, %v1479_v22  ;;  %v2157_v26 = vpop.f32.mrb[10].mxu1 }
 0x7ba   :  { %2383 = vpow2.f32 %v1876_v23  ;;  %v1494_v28 = vadd.f32 %v2157_v26, %v1870_v17  ;;  %v1488_v29 = vpop.f32.mrb[11].mxu1 }
 0x7bb   :  { %2385 = vpow2.f32 %v1875_v25  ;;  %v1489_v31 = vadd.f32 %v1870_v17, %v1488_v29 }
 0x7bc   :  { %v1878_v34 = vmul.f32 -1.442695, %v1494_v28 }
 0x7bd   :  { %v1877_v35 = vmul.f32 -1.442695, %v1489_v31 }
 0x7be   :  { %2387 = vpow2.f32 %v1878_v34 }
 0x7bf   :  { %2389 = vpow2.f32 %v1877_v35 }
 0x7c4   :  { %v2384_v37 = vpop.eup %2383 }
 0x7c5   :  { %v2386_v38 = vpop.eup %2385  ;;  %v1514_v39 = vadd.f32 1.0, %v2384_v37 }
 0x7c6   :  { %v1513_v2 = vadd.f32 1.0, %v2386_v38 }
 0x7c7   :  { %2391 = vrcp.f32 %v1514_v39 }
 0x7c8   :  { %v2388_v4 = vpop.eup %2387  ;;  %2393 = vrcp.f32 %v1513_v2 }
 0x7c9   :  { %v2390_v42 = vpop.eup %2389  ;;  %v1516_v43 = vadd.f32 1.0, %v2388_v4 }
 0x7ca   :  { %v1515_v27 = vadd.f32 1.0, %v2390_v42 }
 0x7cb   :  { %2395 = vrcp.f32 %v1516_v43 }
 0x7cc   :  { %2397 = vrcp.f32 %v1515_v27 }
 0x7cd   :  { %2399 = vtanh.f32 %v1479_v22 }
 0x7ce   :  { %2401 = vtanh.f32 %v1484_v20 }
 0x7cf   :  { %2403 = vtanh.f32 %v1489_v31 }
 0x7d0   :  { %2405 = vtanh.f32 %v1494_v28 }
 0x7d1   :  { %v2392_v9 = vpop.eup %2391 }
 0x7d2   :  { %v2394_v48 = vpop.eup %2393  ;;  %1531 = vrot.lane.b32.xlu1 %v2392_v9, %s2411_s29 }
 0x7d3   :  { %1529 = vrot.lane.b32.xlu0 %v2394_v48, %s2411_s29 }
 0x7d5   :  { %v2396_v10 = vpop.eup %2395 }
 0x7d6   :  { %v2398_v49 = vpop.eup %2397  ;;  %1535 = vrot.lane.b32.xlu1 %v2396_v10, %s2411_s29 }
 0x7d7   :  { %1533 = vrot.lane.b32.xlu0 %v2398_v49, %s2411_s29  ;;  %v2400_v50 = vpop.eup %2399 }
 0x7d8   :  { %v2402_v52 = vpop.eup %2401 }
 0x7d9   :  { %v2404_v18 = vpop.eup %2403 }
 0x7da   :  { %v2406_v60 = vpop.eup %2405 }
 0x844   :  { %v1532_v36 = vpop.permute.xlu1 %1531 }
 0x845   :  { %v1530_v51 = vpop.permute.xlu0 %1529  ;;  %v1542_v55 = vmul.f32 %v2402_v52, %v1532_v36 }
 0x846   :  { %v1541_v53 = vmul.f32 %v2400_v50, %v1530_v51 }
 0x848   :  { %v1536_v57 = vpop.permute.xlu1 %1535  ;;  %2166 = vmatprep.mubr.msk.f32.mxu0 %vm467_vm8, %v1541_v53 }
 0x849   :  { %v1534_v58 = vpop.permute.xlu0 %1533  ;;  %2167 = vmatmul.mubr.msk.f32.vlgmr.msra.gmra.mrb[4].mxu0 %vm467_vm8, %v1542_v55  ;;  %v1544_v63 = vmul.f32 %v2406_v60, %v1536_v57 }
 0x84a   :  { %v1543_v62 = vmul.f32 %v2404_v18, %v1534_v58  ;;  %2301 = vmatpush3.bf16.msra.mxu0 %v2298_v47 }
 0x84b   :  { %2303 = vmatprep.subr.bf16.mxu0 %v2302_v3 }
 0x84c   :  { %2169 = vmatprep.mubr.msk.f32.mxu0 %vm467_vm8, %v1543_v62 }
 0x84d   :  { %2170 = vmatmul.mubr.msk.f32.gmra.mrb[6].mxu0 %vm467_vm8, %v1544_v63 }
 0x84e   :  { %2305 = vmatpush3.bf16.msra.mxu0 %v2302_v3 }
 0x91c   :  { %v2168_v30 = vpop.f32.mrb[4].mxu0 }
 0x91d   :  { %v2311_v32 = vadd.f32 %v2313_v6, %v2168_v30  ;;  %v1636_v7 = vpop.f32.mrb[5].mxu0 }
 0x91e   :  { %v2314_v8 = vadd.f32 %v2313_v6, %v1636_v7 }
 0x91f   :  { %v2312_v11 = vadd.f32 %v2311_v32, %v1884_v61 }
 0x920   :  { %v2315_v56 = vadd.f32 %v2314_v8, %v1884_v61  ;;  %v2171_v46 = vpop.f32.mrb[6].mxu0 }
 0x921   :  { %v1646_v41 = vpop.f32.mrb[7].mxu0  ;;  %v2318_v59 = vadd.f32 %v2320_v40, %v2171_v46 }
 0x922   :  { %v2321_v12 = vadd.f32 %v2320_v40, %v1646_v41  ;;  %2180 = vmatprep.mubr.msk.f32.mxu0 %vm467_vm8, %v2315_v56 }
 0x923   :  { %2181 = vmatmul.mubr.msk.f32.vlgmr.msra.gmra.mrb[16].mxu0 %vm467_vm8, %v2312_v11 }
 0x924   :  { %2183 = vmatprep.mubr.msk.f32.mxu1 %vm467_vm8, %v2321_v12 }
 0x925   :  { %2184 = vmatmul.mubr.msk.f32.vlgmr.msra.gmra.mrb[12].mxu1 %vm467_vm8, %v2318_v59 }
 0x9f6   :  { %v2182_v14 = vpop.f32.mrb[16].mxu0 }
 0x9f7   :  { %v1754_v15 = vadd.f32 %v2182_v14, %v1889_v13  ;;  %v1748_v24 = vpop.f32.mrb[17].mxu0 }
 0x9f8   :  { %v1749_v16 = vadd.f32 %v1889_v13, %v1748_v24  ;;  %v2185_v33 = vpop.f32.mrb[12].mxu1 }
 0x9f9   :  { %1769 = vst.msk [vmem:[%s3000_s11 + $0x8] sm:$0xff] %vm1767_vm7, %v1754_v15  ;;  %v1764_v17 = vadd.f32 %v2185_v33, %v1889_v13  ;;  %v1758_v19 = vpop.f32.mrb[13].mxu1 }
 0x9fa   :  { %1768 = vst.msk [vmem:[%s3000_s11] sm:$0xff] %vm1767_vm7, %v1749_v16  ;;  %v1759_v20 = vadd.f32 %v1889_v13, %v1758_v19 }
 0x9fb   :  { %1771 = vst.msk [vmem:[%s3000_s11 + $0x18] sm:$0xff] %vm1767_vm7, %v1764_v17 }
 0x9fc   :  { %1770 = vst.msk [vmem:[%s3000_s11 + $0x10] sm:$0xff] %vm1767_vm7, %v1759_v20 }

</bundles_post_ra>
